<compile_context>
chip_gen: v7x
topology: tpu7x:2x2x1
jax: 0.10.0
libtpu: 0.0.40
codegen_flags: <defaults>
</compile_context>

<pallas_src>
import functools

import jax
import jax.numpy as jnp
from jax import lax
from jax.experimental import pallas as pl
from jax.experimental.pallas import tpu as pltpu


def _round_up(v, m):
    return ((v + m - 1) // m) * m


def _pick_time_chunk(T, max_chunk=128):
    tc = min(T, max_chunk)
    while T % tc != 0:
        tc -= 1
    return tc


# --------------------------------------------------------------------------
# Pallas kernel: one GRU layer over one time chunk (grid axis = time chunks).
# --------------------------------------------------------------------------
def _gru_layer_kernel(x_ref, wih_ref, whh_ref, bfold_ref, bhn_ref, h0_ref,
                      y_ref, hT_ref, h_scratch, gi_scratch,
                      *, hidden_pad, time_chunk, unroll):
    # x_ref:   (TC, Bp, Dinp)  time-major padded input chunk
    # wih_ref: (Dinp, 3*Hp)    input->gates weights (gate-block padded, transposed)
    # whh_ref: (Hp, 3*Hp)      hidden->gates weights
    # bfold_ref: (1, 3*Hp)     b_ih (+ b_hh for r,z gates), padded
    # bhn_ref:   (1, Hp)       b_hh for n gate (must stay inside r * (...))
    # h0_ref:  (Bp, Hp)        initial hidden state
    # y_ref:   (TC, Bp, Hp)    per-step hidden outputs (lane-dense)
    # hT_ref:  (Bp, Hp)        final hidden state
    Hp = hidden_pad
    TC = time_chunk
    Bp = x_ref.shape[1]

    # Persistent hidden state across time chunks.
    @pl.when(pl.program_id(0) == 0)
    def _():
        h_scratch[...] = h0_ref[...]

    # Hoisted input->gates GEMM for the whole chunk: one MXU-friendly GEMM
    # instead of TC tiny matmuls inside the recurrence.
    x_chunk = x_ref[...].reshape(TC * Bp, x_ref.shape[2])
    gi = jnp.dot(x_chunk, wih_ref[...], preferred_element_type=jnp.float32)
    gi = gi + bfold_ref[...]
    gi_scratch[...] = gi.reshape(TC, Bp, 3 * Hp)

    whh = whh_ref[...]
    bhn = bhn_ref[...]

    def step(t, h_prev):
        gi_t = gi_scratch[t]                                     # (Bp, 3Hp)
        gh = jnp.dot(h_prev, whh, preferred_element_type=jnp.float32)
        # PyTorch GRU gate order: reset, update, new (lane-aligned slices).
        r = jax.nn.sigmoid(gi_t[:, 0:Hp] + gh[:, 0:Hp])
        z = jax.nn.sigmoid(gi_t[:, Hp:2 * Hp] + gh[:, Hp:2 * Hp])
        n = jnp.tanh(gi_t[:, 2 * Hp:3 * Hp] + r * (gh[:, 2 * Hp:3 * Hp] + bhn))
        h = (1.0 - z) * n + z * h_prev
        y_ref[t] = h.astype(y_ref.dtype)
        return h

    # h is carried in registers (single (8,128) vreg per 128 of Hp); the VMEM
    # scratch is only touched once per chunk.
    h_init = h_scratch[...]
    h_final = lax.fori_loop(0, TC, step, h_init, unroll=unroll)
    h_scratch[...] = h_final
    hT_ref[...] = h_final


def gru_layer_pallas(x_tm, w_ih_p, w_hh_p, b_fold, b_hn, h0_p, hidden_pad,
                     time_chunk):
    """One GRU layer. x_tm is padded time-major (T, Bp, Dinp)."""
    T, Bp, Dinp = x_tm.shape
    Hp = hidden_pad
    n_chunks = T // time_chunk
    unroll = True if time_chunk <= 16 else 8
    kernel = functools.partial(_gru_layer_kernel, hidden_pad=Hp,
                               time_chunk=time_chunk, unroll=unroll)
    y_tm, h_T = pl.pallas_call(
        kernel,
        grid=(n_chunks,),
        in_specs=[
            pl.BlockSpec((time_chunk, Bp, Dinp), lambda c: (c, 0, 0)),
            pl.BlockSpec((Dinp, 3 * Hp), lambda c: (0, 0)),
            pl.BlockSpec((Hp, 3 * Hp), lambda c: (0, 0)),
            pl.BlockSpec((1, 3 * Hp), lambda c: (0, 0)),
            pl.BlockSpec((1, Hp), lambda c: (0, 0)),
            pl.BlockSpec((Bp, Hp), lambda c: (0, 0)),
        ],
        out_specs=(
            pl.BlockSpec((time_chunk, Bp, Hp), lambda c: (c, 0, 0)),
            pl.BlockSpec((Bp, Hp), lambda c: (0, 0)),
        ),
        out_shape=(
            jax.ShapeDtypeStruct((T, Bp, Hp), jnp.float32),
            jax.ShapeDtypeStruct((Bp, Hp), jnp.float32),
        ),
        scratch_shapes=[
            pltpu.VMEM((Bp, Hp), jnp.float32),                 # persistent h
            pltpu.VMEM((time_chunk, Bp, 3 * Hp), jnp.float32),  # hoisted gi
        ],
        compiler_params=pltpu.CompilerParams(
            dimension_semantics=("arbitrary",)),
    )(x_tm, w_ih_p, w_hh_p, b_fold, b_hn, h0_p)
    return y_tm, h_T


def _pack_gru_params(w_ih, w_hh, b_ih, b_hh, din, H, din_p, Hp):
    """Pad + transpose PyTorch-shaped GRU params into lane-dense kernel layout."""
    w_ih_p = jnp.zeros((din_p, 3 * Hp), jnp.float32)
    w_hh_p = jnp.zeros((Hp, 3 * Hp), jnp.float32)
    b_fold = jnp.zeros((1, 3 * Hp), jnp.float32)
    for g in range(3):
        w_ih_p = w_ih_p.at[:din, g * Hp:g * Hp + H].set(w_ih[g * H:(g + 1) * H, :].T)
        w_hh_p = w_hh_p.at[:H, g * Hp:g * Hp + H].set(w_hh[g * H:(g + 1) * H, :].T)
        bb = b_ih[g * H:(g + 1) * H]
        if g < 2:  # r, z gates: fold b_hh in as well
            bb = bb + b_hh[g * H:(g + 1) * H]
        b_fold = b_fold.at[0, g * Hp:g * Hp + H].set(bb)
    b_hn = jnp.zeros((1, Hp), jnp.float32).at[0, :H].set(b_hh[2 * H:3 * H])
    return (w_ih_p, w_hh_p, b_fold, b_hn)


# --------------------------------------------------------------------------
# CPCAR (multi-layer GRU, batch_first) backed by the Pallas kernel.
# --------------------------------------------------------------------------
class CPCAR:
    def __init__(self, dimEncoded, dimOutput, keepHidden, nLevelsGRU,
                 mode='GRU', reverse=False, key=None):
        self.RESIDUAL_STD = 0.1
        if mode != 'GRU':
            # TODO(synk): LSTM / RNN modes of the original module are not ported.
            raise NotImplementedError("Only mode='GRU' is implemented in the Pallas port.")
        self.dimEncoded = dimEncoded
        self.dimOutput = dimOutput
        self.nLevels = nLevelsGRU
        self.keepHidden = keepHidden
        self.reverse = reverse
        self.hidden = None  # (num_layers, B, H) when keepHidden

        self.Hp = _round_up(dimOutput, 128)
        self.Dinp0 = _round_up(dimEncoded, 128)

        if key is None:
            key = jax.random.PRNGKey(0)
        k = 1.0 / jnp.sqrt(dimOutput)
        self.params = []      # padded / folded params for the kernel
        self.ref_params = []  # plain transposed params for the JAX reference
        for layer in range(nLevelsGRU):
            din = dimEncoded if layer == 0 else dimOutput
            din_p = self.Dinp0 if layer == 0 else self.Hp
            key, k1, k2, k3, k4 = jax.random.split(key, 5)
            # PyTorch shapes: w_ih (3H, Din), w_hh (3H, H), biases (3H,)
            w_ih = jax.random.uniform(k1, (3 * dimOutput, din), jnp.float32, -k, k)
            w_hh = jax.random.uniform(k2, (3 * dimOutput, dimOutput), jnp.float32, -k, k)
            b_ih = jax.random.uniform(k3, (3 * dimOutput,), jnp.float32, -k, k)
            b_hh = jax.random.uniform(k4, (3 * dimOutput,), jnp.float32, -k, k)
            self.ref_params.append((w_ih.T, w_hh.T,
                                    b_ih.reshape(1, -1), b_hh.reshape(1, -1)))
            self.params.append(_pack_gru_params(w_ih, w_hh, b_ih, b_hh,
                                                din, dimOutput, din_p, self.Hp))

    def getDimOutput(self):
        return self.dimOutput

    def forward(self, x):
        # x: (B, T, dimEncoded), matching PyTorch's batch_first GRU input.
        B, T, Din = x.shape
        if self.reverse:
            x = jnp.flip(x, axis=1)

        Bp = _round_up(B, 8)
        x_tm = jnp.transpose(x, (1, 0, 2)).astype(jnp.float32)          # (T,B,D)
        x_tm = jnp.pad(x_tm, ((0, 0), (0, Bp - B), (0, self.Dinp0 - Din)))
        tc = _pick_time_chunk(T)

        final_hiddens = []
        for layer, (w_ih_p, w_hh_p, b_fold, b_hn) in enumerate(self.params):
            if self.hidden is not None:
                h0 = self.hidden[layer]
                h0_p = jnp.pad(h0, ((0, Bp - B), (0, self.Hp - self.dimOutput)))
            else:
                h0_p = jnp.zeros((Bp, self.Hp), jnp.float32)
            # layer>0 inputs are already lane-dense padded (Hp), reuse directly.
            x_tm, h_T = gru_layer_pallas(x_tm, w_ih_p, w_hh_p, b_fold, b_hn,
                                         h0_p, self.Hp, tc)
            final_hiddens.append(h_T[:B, :self.dimOutput])

        if self.keepHidden:
            # .detach() equivalent
            self.hidden = lax.stop_gradient(jnp.stack(final_hiddens, axis=0))

        y = jnp.transpose(x_tm[:, :B, :self.dimOutput], (1, 0, 2))   # (B,T,H)
        if self.reverse:
            y = jnp.flip(y, axis=1)
        return y

    __call__ = forward


# --------------------------------------------------------------------------
# CPC sub-model + ConcatenatedModel (the module in the spec).
# --------------------------------------------------------------------------
class CPCModelStub:
    """Minimal CPC sub-model: (batchData, label) -> (cFeature, encodedData, label).
    # TODO(synk): the convolutional CPCEncoder of the original CPC model is not
    # ported here; batchData is treated as already-encoded features.
    """
    def __init__(self, gAR):
        self.gAR = gAR

    def __call__(self, batchData, label):
        encodedData = batchData
        cFeature = self.gAR(encodedData)
        return cFeature, encodedData, label


class ConcatenatedModel:
    def __init__(self, model_list):
        self.models = list(model_list)

    def forward(self, batchData, label):
        outFeatures = []
        outEncoded = []
        for model in self.models:
            cFeature, encodedData, label = model(batchData, label)
            outFeatures.append(cFeature)
            outEncoded.append(encodedData)
        return (jnp.concatenate(outFeatures, axis=2),
                jnp.concatenate(outEncoded, axis=2),
                label)

    __call__ = forward


# --------------------------------------------------------------------------
# Pure-JAX reference GRU (correctness check of the kernel).
# --------------------------------------------------------------------------
def gru_reference(x, ref_params, dim_out):
    B, T, _ = x.shape
    h_in = x.astype(jnp.float32)
    for (w_ih_t, w_hh_t, b_ih, b_hh) in ref_params:
        H = dim_out
        h = jnp.zeros((B, H), jnp.float32)

        def step(h_prev, x_t):
            gi = x_t @ w_ih_t + b_ih
            gh = h_prev @ w_hh_t + b_hh
            r = jax.nn.sigmoid(gi[:, 0:H] + gh[:, 0:H])
            z = jax.nn.sigmoid(gi[:, H:2 * H] + gh[:, H:2 * H])
            n = jnp.tanh(gi[:, 2 * H:3 * H] + r * gh[:, 2 * H:3 * H])
            h_new = (1.0 - z) * n + z * h_prev
            return h_new, h_new

        _, ys = lax.scan(step, h, jnp.transpose(h_in, (1, 0, 2)))
        h_in = jnp.transpose(ys, (1, 0, 2))
    return h_in


# --------------------------------------------------------------------------
if __name__ == "__main__":
    B, T = 2, 8
    dimEncoded, dimOutput, nLevelsGRU = 16, 32, 2

    key = jax.random.PRNGKey(0)
    k_x, k_p1, k_p2 = jax.random.split(key, 3)
    x = jax.random.normal(k_x, (B, T, dimEncoded), jnp.float32)
    label = jnp.zeros((B,), jnp.int32)

    ar1 = CPCAR(dimEncoded, dimOutput, keepHidden=True,
                nLevelsGRU=nLevelsGRU, mode='GRU', reverse=False, key=k_p1)
    ar2 = CPCAR(dimEncoded, dimOutput, keepHidden=True,
                nLevelsGRU=nLevelsGRU, mode='GRU', reverse=False, key=k_p2)
    model = ConcatenatedModel([CPCModelStub(ar1), CPCModelStub(ar2)])

    cFeat, enc, lab = model(x, label)
    cFeat = jax.block_until_ready(cFeat)
    enc = jax.block_until_ready(enc)

    # Correctness check against pure-JAX reference (per sub-model, then concat).
    ref_feat = jnp.concatenate(
        [gru_reference(x, ar1.ref_params, dimOutput),
         gru_reference(x, ar2.ref_params, dimOutput)], axis=2)
    ref_feat = jax.block_until_ready(ref_feat)

    assert cFeat.shape == (B, T, 2 * dimOutput)
    assert enc.shape == (B, T, 2 * dimEncoded)
    assert jnp.allclose(enc, jnp.concatenate([x, x], axis=2))
    assert jnp.allclose(cFeat, ref_feat, atol=1e-5, rtol=1e-5), \
        f"max diff {jnp.max(jnp.abs(cFeat - ref_feat))}"

    print("KERNEL_OK")
</pallas_src>

<mosaic_0001>
module attributes {stable_mosaic.version = 11 : i64} {
  func.func @_gru_layer_kernel(%arg0: i32, %arg1: memref<8x8x128xf32, #tpu.memory_space<vmem>>, %arg2: memref<128x384xf32, #tpu.memory_space<vmem>>, %arg3: memref<128x384xf32, #tpu.memory_space<vmem>>, %arg4: memref<1x384xf32, #tpu.memory_space<vmem>>, %arg5: memref<1x128xf32, #tpu.memory_space<vmem>>, %arg6: memref<8x128xf32, #tpu.memory_space<vmem>>, %arg7: memref<8x8x128xf32, #tpu.memory_space<vmem>>, %arg8: memref<8x128xf32, #tpu.memory_space<vmem>>, %arg9: memref<8x128xf32, #tpu.memory_space<vmem>>, %arg10: memref<8x8x384xf32, #tpu.memory_space<vmem>>) attributes {dimension_semantics = [#tpu.dimension_semantics<arbitrary>], iteration_bounds = array<i64: 1>, scalar_prefetch = 0 : i64, scratch_operands = 2 : i64, tpu.core_type = #tpu.core_type<tc>, window_params = [{transform_indices = @transform_0, window_bounds = array<i64: 8, 8, 128>}, {pipeline_mode = #tpu.pipeline_mode<synchronous>, transform_indices = @transform_1, window_bounds = array<i64: 128, 384>}, {pipeline_mode = #tpu.pipeline_mode<synchronous>, transform_indices = @transform_2, window_bounds = array<i64: 128, 384>}, {pipeline_mode = #tpu.pipeline_mode<synchronous>, transform_indices = @transform_3, window_bounds = array<i64: 1, 384>}, {pipeline_mode = #tpu.pipeline_mode<synchronous>, transform_indices = @transform_4, window_bounds = array<i64: 1, 128>}, {pipeline_mode = #tpu.pipeline_mode<synchronous>, transform_indices = @transform_5, window_bounds = array<i64: 8, 128>}, {transform_indices = @transform_6, window_bounds = array<i64: 8, 8, 128>}, {pipeline_mode = #tpu.pipeline_mode<synchronous>, transform_indices = @transform_7, window_bounds = array<i64: 8, 128>}]} {
    %c0_i32 = arith.constant 0 : i32
    %0 = arith.cmpi eq, %arg0, %c0_i32 : i32
    %1 = arith.extui %0 : i1 to i32
    %c0_i32_0 = arith.constant 0 : i32
    %2 = arith.cmpi ne, %1, %c0_i32_0 : i32
    scf.if %2 {
      %c0_85 = arith.constant 0 : index
      %c0_86 = arith.constant 0 : index
      %305 = vector.load %arg6[%c0_85, %c0_86] : memref<8x128xf32, #tpu.memory_space<vmem>>, vector<8x128xf32>
      %c0_87 = arith.constant 0 : index
      %c0_88 = arith.constant 0 : index
      %306 = vector.load %arg9[%c0_87, %c0_88] : memref<8x128xf32, #tpu.memory_space<vmem>>, vector<8x128xf32>
      tpu.vector_store %arg9[%c0_87, %c0_88], %305 {strides = array<i32>} : memref<8x128xf32, #tpu.memory_space<vmem>>, vector<8x128xf32>,
    } else {
    }
    %c0 = arith.constant 0 : index
    %c0_1 = arith.constant 0 : index
    %c0_2 = arith.constant 0 : index
    %3 = vector.load %arg1[%c0, %c0_1, %c0_2] : memref<8x8x128xf32, #tpu.memory_space<vmem>>, vector<8x8x128xf32>
    %4 = vector.shape_cast %3 : vector<8x8x128xf32> to vector<64x128xf32>
    %c0_3 = arith.constant 0 : index
    %c0_4 = arith.constant 0 : index
    %5 = vector.load %arg2[%c0_3, %c0_4] : memref<128x384xf32, #tpu.memory_space<vmem>>, vector<128x384xf32>
    %cst = arith.constant dense<0.000000e+00> : vector<64x384xf32>
    %6 = tpu.matmul %4, %5, %cst {dimension_numbers = #tpu.dot_dimension_numbers<[1], [0], [0], [1], [0, 0, 1, 1], [], []>} : vector<64x128xf32>, vector<128x384xf32>, vector<64x384xf32> -> vector<64x384xf32>
    %c0_5 = arith.constant 0 : index
    %c0_6 = arith.constant 0 : index
    %7 = vector.load %arg4[%c0_5, %c0_6] : memref<1x384xf32, #tpu.memory_space<vmem>>, vector<1x384xf32>
    %8 = vector.broadcast %7 : vector<1x384xf32> to vector<64x384xf32>
    %9 = arith.addf %6, %8 : vector<64x384xf32>
    %10 = vector.shape_cast %9 : vector<64x384xf32> to vector<8x8x384xf32>
    %c0_7 = arith.constant 0 : index
    %c0_8 = arith.constant 0 : index
    %c0_9 = arith.constant 0 : index
    %11 = vector.load %arg10[%c0_7, %c0_8, %c0_9] : memref<8x8x384xf32, #tpu.memory_space<vmem>>, vector<8x8x384xf32>
    tpu.vector_store %arg10[%c0_7, %c0_8, %c0_9], %10 {strides = array<i32>} : memref<8x8x384xf32, #tpu.memory_space<vmem>>, vector<8x8x384xf32>,
    %c0_10 = arith.constant 0 : index
    %c0_11 = arith.constant 0 : index
    %12 = vector.load %arg3[%c0_10, %c0_11] : memref<128x384xf32, #tpu.memory_space<vmem>>, vector<128x384xf32>
    %c0_12 = arith.constant 0 : index
    %c0_13 = arith.constant 0 : index
    %13 = vector.load %arg5[%c0_12, %c0_13] : memref<1x128xf32, #tpu.memory_space<vmem>>, vector<1x128xf32>
    %c0_14 = arith.constant 0 : index
    %c0_15 = arith.constant 0 : index
    %14 = vector.load %arg9[%c0_14, %c0_15] : memref<8x128xf32, #tpu.memory_space<vmem>>, vector<8x128xf32>
    %c0_i32_16 = arith.constant 0 : i32
    %15 = arith.index_cast %c0_i32_16 : i32 to index
    %c0_17 = arith.constant 0 : index
    %c0_18 = arith.constant 0 : index
    %16 = vector.load %arg10[%15, %c0_17, %c0_18] : memref<8x8x384xf32, #tpu.memory_space<vmem>>, vector<1x8x384xf32>
    %17 = vector.shape_cast %16 : vector<1x8x384xf32> to vector<8x384xf32>
    %cst_19 = arith.constant dense<0.000000e+00> : vector<8x384xf32>
    %18 = tpu.matmul %14, %12, %cst_19 {dimension_numbers = #tpu.dot_dimension_numbers<[1], [0], [0], [1], [0, 0, 1, 1], [], []>} : vector<8x128xf32>, vector<128x384xf32>, vector<8x384xf32> -> vector<8x384xf32>
    %19 = vector.extract_strided_slice %17 {offsets = [0, 0], sizes = [8, 128], strides = [1, 1]} : vector<8x384xf32> to vector<8x128xf32>
    %20 = vector.extract_strided_slice %18 {offsets = [0, 0], sizes = [8, 128], strides = [1, 1]} : vector<8x384xf32> to vector<8x128xf32>
    %21 = arith.addf %19, %20 : vector<8x128xf32>
    %22 = arith.negf %21 : vector<8x128xf32>
    %23 = math.exp %22 : vector<8x128xf32>
    %cst_20 = arith.constant 1.000000e+00 : f32
    %24 = vector.broadcast %cst_20 : f32 to vector<8x128xf32>
    %25 = arith.addf %24, %23 : vector<8x128xf32>
    %26 = arith.divf %24, %25 : vector<8x128xf32>
    %27 = vector.extract_strided_slice %17 {offsets = [0, 128], sizes = [8, 128], strides = [1, 1]} : vector<8x384xf32> to vector<8x128xf32>
    %28 = vector.extract_strided_slice %18 {offsets = [0, 128], sizes = [8, 128], strides = [1, 1]} : vector<8x384xf32> to vector<8x128xf32>
    %29 = arith.addf %27, %28 : vector<8x128xf32>
    %30 = arith.negf %29 : vector<8x128xf32>
    %31 = math.exp %30 : vector<8x128xf32>
    %cst_21 = arith.constant 1.000000e+00 : f32
    %32 = vector.broadcast %cst_21 : f32 to vector<8x128xf32>
    %33 = arith.addf %32, %31 : vector<8x128xf32>
    %34 = arith.divf %32, %33 : vector<8x128xf32>
    %35 = vector.extract_strided_slice %17 {offsets = [0, 256], sizes = [8, 128], strides = [1, 1]} : vector<8x384xf32> to vector<8x128xf32>
    %36 = vector.extract_strided_slice %18 {offsets = [0, 256], sizes = [8, 128], strides = [1, 1]} : vector<8x384xf32> to vector<8x128xf32>
    %37 = vector.broadcast %13 : vector<1x128xf32> to vector<8x128xf32>
    %38 = arith.addf %36, %37 : vector<8x128xf32>
    %39 = arith.mulf %26, %38 : vector<8x128xf32>
    %40 = arith.addf %35, %39 : vector<8x128xf32>
    %41 = math.tanh %40 : vector<8x128xf32>
    %cst_22 = arith.constant 1.000000e+00 : f32
    %42 = vector.broadcast %cst_22 : f32 to vector<8x128xf32>
    %43 = arith.subf %42, %34 : vector<8x128xf32>
    %44 = arith.mulf %43, %41 : vector<8x128xf32>
    %45 = arith.mulf %34, %14 : vector<8x128xf32>
    %46 = arith.addf %44, %45 : vector<8x128xf32>
    %47 = arith.index_cast %c0_i32_16 : i32 to index
    %c0_23 = arith.constant 0 : index
    %c0_24 = arith.constant 0 : index
    %48 = vector.load %arg7[%47, %c0_23, %c0_24] : memref<8x8x128xf32, #tpu.memory_space<vmem>>, vector<1x8x128xf32>
    %49 = vector.shape_cast %48 : vector<1x8x128xf32> to vector<8x128xf32>
    %50 = vector.shape_cast %46 : vector<8x128xf32> to vector<1x8x128xf32>
    tpu.vector_store %arg7[%47, %c0_23, %c0_24], %50 {strides = array<i32>} : memref<8x8x128xf32, #tpu.memory_space<vmem>>, vector<1x8x128xf32>,
    %c1_i32 = arith.constant 1 : i32
    %51 = arith.index_cast %c1_i32 : i32 to index
    %c0_25 = arith.constant 0 : index
    %c0_26 = arith.constant 0 : index
    %52 = vector.load %arg10[%51, %c0_25, %c0_26] : memref<8x8x384xf32, #tpu.memory_space<vmem>>, vector<1x8x384xf32>
    %53 = vector.shape_cast %52 : vector<1x8x384xf32> to vector<8x384xf32>
    %cst_27 = arith.constant dense<0.000000e+00> : vector<8x384xf32>
    %54 = tpu.matmul %46, %12, %cst_27 {dimension_numbers = #tpu.dot_dimension_numbers<[1], [0], [0], [1], [0, 0, 1, 1], [], []>} : vector<8x128xf32>, vector<128x384xf32>, vector<8x384xf32> -> vector<8x384xf32>
    %55 = vector.extract_strided_slice %53 {offsets = [0, 0], sizes = [8, 128], strides = [1, 1]} : vector<8x384xf32> to vector<8x128xf32>
    %56 = vector.extract_strided_slice %54 {offsets = [0, 0], sizes = [8, 128], strides = [1, 1]} : vector<8x384xf32> to vector<8x128xf32>
    %57 = arith.addf %55, %56 : vector<8x128xf32>
    %58 = arith.negf %57 : vector<8x128xf32>
    %59 = math.exp %58 : vector<8x128xf32>
    %cst_28 = arith.constant 1.000000e+00 : f32
    %60 = vector.broadcast %cst_28 : f32 to vector<8x128xf32>
    %61 = arith.addf %60, %59 : vector<8x128xf32>
    %62 = arith.divf %60, %61 : vector<8x128xf32>
    %63 = vector.extract_strided_slice %53 {offsets = [0, 128], sizes = [8, 128], strides = [1, 1]} : vector<8x384xf32> to vector<8x128xf32>
    %64 = vector.extract_strided_slice %54 {offsets = [0, 128], sizes = [8, 128], strides = [1, 1]} : vector<8x384xf32> to vector<8x128xf32>
    %65 = arith.addf %63, %64 : vector<8x128xf32>
    %66 = arith.negf %65 : vector<8x128xf32>
    %67 = math.exp %66 : vector<8x128xf32>
    %cst_29 = arith.constant 1.000000e+00 : f32
    %68 = vector.broadcast %cst_29 : f32 to vector<8x128xf32>
    %69 = arith.addf %68, %67 : vector<8x128xf32>
    %70 = arith.divf %68, %69 : vector<8x128xf32>
    %71 = vector.extract_strided_slice %53 {offsets = [0, 256], sizes = [8, 128], strides = [1, 1]} : vector<8x384xf32> to vector<8x128xf32>
    %72 = vector.extract_strided_slice %54 {offsets = [0, 256], sizes = [8, 128], strides = [1, 1]} : vector<8x384xf32> to vector<8x128xf32>
    %73 = vector.broadcast %13 : vector<1x128xf32> to vector<8x128xf32>
    %74 = arith.addf %72, %73 : vector<8x128xf32>
    %75 = arith.mulf %62, %74 : vector<8x128xf32>
    %76 = arith.addf %71, %75 : vector<8x128xf32>
    %77 = math.tanh %76 : vector<8x128xf32>
    %cst_30 = arith.constant 1.000000e+00 : f32
    %78 = vector.broadcast %cst_30 : f32 to vector<8x128xf32>
    %79 = arith.subf %78, %70 : vector<8x128xf32>
    %80 = arith.mulf %79, %77 : vector<8x128xf32>
    %81 = arith.mulf %70, %46 : vector<8x128xf32>
    %82 = arith.addf %80, %81 : vector<8x128xf32>
    %83 = arith.index_cast %c1_i32 : i32 to index
    %c0_31 = arith.constant 0 : index
    %c0_32 = arith.constant 0 : index
    %84 = vector.load %arg7[%83, %c0_31, %c0_32] : memref<8x8x128xf32, #tpu.memory_space<vmem>>, vector<1x8x128xf32>
    %85 = vector.shape_cast %84 : vector<1x8x128xf32> to vector<8x128xf32>
    %86 = vector.shape_cast %82 : vector<8x128xf32> to vector<1x8x128xf32>
    tpu.vector_store %arg7[%83, %c0_31, %c0_32], %86 {strides = array<i32>} : memref<8x8x128xf32, #tpu.memory_space<vmem>>, vector<1x8x128xf32>,
    %c2_i32 = arith.constant 2 : i32
    %87 = arith.index_cast %c2_i32 : i32 to index
    %c0_33 = arith.constant 0 : index
    %c0_34 = arith.constant 0 : index
    %88 = vector.load %arg10[%87, %c0_33, %c0_34] : memref<8x8x384xf32, #tpu.memory_space<vmem>>, vector<1x8x384xf32>
    %89 = vector.shape_cast %88 : vector<1x8x384xf32> to vector<8x384xf32>
    %cst_35 = arith.constant dense<0.000000e+00> : vector<8x384xf32>
    %90 = tpu.matmul %82, %12, %cst_35 {dimension_numbers = #tpu.dot_dimension_numbers<[1], [0], [0], [1], [0, 0, 1, 1], [], []>} : vector<8x128xf32>, vector<128x384xf32>, vector<8x384xf32> -> vector<8x384xf32>
    %91 = vector.extract_strided_slice %89 {offsets = [0, 0], sizes = [8, 128], strides = [1, 1]} : vector<8x384xf32> to vector<8x128xf32>
    %92 = vector.extract_strided_slice %90 {offsets = [0, 0], sizes = [8, 128], strides = [1, 1]} : vector<8x384xf32> to vector<8x128xf32>
    %93 = arith.addf %91, %92 : vector<8x128xf32>
    %94 = arith.negf %93 : vector<8x128xf32>
    %95 = math.exp %94 : vector<8x128xf32>
    %cst_36 = arith.constant 1.000000e+00 : f32
    %96 = vector.broadcast %cst_36 : f32 to vector<8x128xf32>
    %97 = arith.addf %96, %95 : vector<8x128xf32>
    %98 = arith.divf %96, %97 : vector<8x128xf32>
    %99 = vector.extract_strided_slice %89 {offsets = [0, 128], sizes = [8, 128], strides = [1, 1]} : vector<8x384xf32> to vector<8x128xf32>
    %100 = vector.extract_strided_slice %90 {offsets = [0, 128], sizes = [8, 128], strides = [1, 1]} : vector<8x384xf32> to vector<8x128xf32>
    %101 = arith.addf %99, %100 : vector<8x128xf32>
    %102 = arith.negf %101 : vector<8x128xf32>
    %103 = math.exp %102 : vector<8x128xf32>
    %cst_37 = arith.constant 1.000000e+00 : f32
    %104 = vector.broadcast %cst_37 : f32 to vector<8x128xf32>
    %105 = arith.addf %104, %103 : vector<8x128xf32>
    %106 = arith.divf %104, %105 : vector<8x128xf32>
    %107 = vector.extract_strided_slice %89 {offsets = [0, 256], sizes = [8, 128], strides = [1, 1]} : vector<8x384xf32> to vector<8x128xf32>
    %108 = vector.extract_strided_slice %90 {offsets = [0, 256], sizes = [8, 128], strides = [1, 1]} : vector<8x384xf32> to vector<8x128xf32>
    %109 = vector.broadcast %13 : vector<1x128xf32> to vector<8x128xf32>
    %110 = arith.addf %108, %109 : vector<8x128xf32>
    %111 = arith.mulf %98, %110 : vector<8x128xf32>
    %112 = arith.addf %107, %111 : vector<8x128xf32>
    %113 = math.tanh %112 : vector<8x128xf32>
    %cst_38 = arith.constant 1.000000e+00 : f32
    %114 = vector.broadcast %cst_38 : f32 to vector<8x128xf32>
    %115 = arith.subf %114, %106 : vector<8x128xf32>
    %116 = arith.mulf %115, %113 : vector<8x128xf32>
    %117 = arith.mulf %106, %82 : vector<8x128xf32>
    %118 = arith.addf %116, %117 : vector<8x128xf32>
    %119 = arith.index_cast %c2_i32 : i32 to index
    %c0_39 = arith.constant 0 : index
    %c0_40 = arith.constant 0 : index
    %120 = vector.load %arg7[%119, %c0_39, %c0_40] : memref<8x8x128xf32, #tpu.memory_space<vmem>>, vector<1x8x128xf32>
    %121 = vector.shape_cast %120 : vector<1x8x128xf32> to vector<8x128xf32>
    %122 = vector.shape_cast %118 : vector<8x128xf32> to vector<1x8x128xf32>
    tpu.vector_store %arg7[%119, %c0_39, %c0_40], %122 {strides = array<i32>} : memref<8x8x128xf32, #tpu.memory_space<vmem>>, vector<1x8x128xf32>,
    %c3_i32 = arith.constant 3 : i32
    %123 = arith.index_cast %c3_i32 : i32 to index
    %c0_41 = arith.constant 0 : index
    %c0_42 = arith.constant 0 : index
    %124 = vector.load %arg10[%123, %c0_41, %c0_42] : memref<8x8x384xf32, #tpu.memory_space<vmem>>, vector<1x8x384xf32>
    %125 = vector.shape_cast %124 : vector<1x8x384xf32> to vector<8x384xf32>
    %cst_43 = arith.constant dense<0.000000e+00> : vector<8x384xf32>
    %126 = tpu.matmul %118, %12, %cst_43 {dimension_numbers = #tpu.dot_dimension_numbers<[1], [0], [0], [1], [0, 0, 1, 1], [], []>} : vector<8x128xf32>, vector<128x384xf32>, vector<8x384xf32> -> vector<8x384xf32>
    %127 = vector.extract_strided_slice %125 {offsets = [0, 0], sizes = [8, 128], strides = [1, 1]} : vector<8x384xf32> to vector<8x128xf32>
    %128 = vector.extract_strided_slice %126 {offsets = [0, 0], sizes = [8, 128], strides = [1, 1]} : vector<8x384xf32> to vector<8x128xf32>
    %129 = arith.addf %127, %128 : vector<8x128xf32>
    %130 = arith.negf %129 : vector<8x128xf32>
    %131 = math.exp %130 : vector<8x128xf32>
    %cst_44 = arith.constant 1.000000e+00 : f32
    %132 = vector.broadcast %cst_44 : f32 to vector<8x128xf32>
    %133 = arith.addf %132, %131 : vector<8x128xf32>
    %134 = arith.divf %132, %133 : vector<8x128xf32>
    %135 = vector.extract_strided_slice %125 {offsets = [0, 128], sizes = [8, 128], strides = [1, 1]} : vector<8x384xf32> to vector<8x128xf32>
    %136 = vector.extract_strided_slice %126 {offsets = [0, 128], sizes = [8, 128], strides = [1, 1]} : vector<8x384xf32> to vector<8x128xf32>
    %137 = arith.addf %135, %136 : vector<8x128xf32>
    %138 = arith.negf %137 : vector<8x128xf32>
    %139 = math.exp %138 : vector<8x128xf32>
    %cst_45 = arith.constant 1.000000e+00 : f32
    %140 = vector.broadcast %cst_45 : f32 to vector<8x128xf32>
    %141 = arith.addf %140, %139 : vector<8x128xf32>
    %142 = arith.divf %140, %141 : vector<8x128xf32>
    %143 = vector.extract_strided_slice %125 {offsets = [0, 256], sizes = [8, 128], strides = [1, 1]} : vector<8x384xf32> to vector<8x128xf32>
    %144 = vector.extract_strided_slice %126 {offsets = [0, 256], sizes = [8, 128], strides = [1, 1]} : vector<8x384xf32> to vector<8x128xf32>
    %145 = vector.broadcast %13 : vector<1x128xf32> to vector<8x128xf32>
    %146 = arith.addf %144, %145 : vector<8x128xf32>
    %147 = arith.mulf %134, %146 : vector<8x128xf32>
    %148 = arith.addf %143, %147 : vector<8x128xf32>
    %149 = math.tanh %148 : vector<8x128xf32>
    %cst_46 = arith.constant 1.000000e+00 : f32
    %150 = vector.broadcast %cst_46 : f32 to vector<8x128xf32>
    %151 = arith.subf %150, %142 : vector<8x128xf32>
    %152 = arith.mulf %151, %149 : vector<8x128xf32>
    %153 = arith.mulf %142, %118 : vector<8x128xf32>
    %154 = arith.addf %152, %153 : vector<8x128xf32>
    %155 = arith.index_cast %c3_i32 : i32 to index
    %c0_47 = arith.constant 0 : index
    %c0_48 = arith.constant 0 : index
    %156 = vector.load %arg7[%155, %c0_47, %c0_48] : memref<8x8x128xf32, #tpu.memory_space<vmem>>, vector<1x8x128xf32>
    %157 = vector.shape_cast %156 : vector<1x8x128xf32> to vector<8x128xf32>
    %158 = vector.shape_cast %154 : vector<8x128xf32> to vector<1x8x128xf32>
    tpu.vector_store %arg7[%155, %c0_47, %c0_48], %158 {strides = array<i32>} : memref<8x8x128xf32, #tpu.memory_space<vmem>>, vector<1x8x128xf32>,
    %c4_i32 = arith.constant 4 : i32
    %159 = arith.index_cast %c4_i32 : i32 to index
    %c0_49 = arith.constant 0 : index
    %c0_50 = arith.constant 0 : index
    %160 = vector.load %arg10[%159, %c0_49, %c0_50] : memref<8x8x384xf32, #tpu.memory_space<vmem>>, vector<1x8x384xf32>
    %161 = vector.shape_cast %160 : vector<1x8x384xf32> to vector<8x384xf32>
    %cst_51 = arith.constant dense<0.000000e+00> : vector<8x384xf32>
    %162 = tpu.matmul %154, %12, %cst_51 {dimension_numbers = #tpu.dot_dimension_numbers<[1], [0], [0], [1], [0, 0, 1, 1], [], []>} : vector<8x128xf32>, vector<128x384xf32>, vector<8x384xf32> -> vector<8x384xf32>
    %163 = vector.extract_strided_slice %161 {offsets = [0, 0], sizes = [8, 128], strides = [1, 1]} : vector<8x384xf32> to vector<8x128xf32>
    %164 = vector.extract_strided_slice %162 {offsets = [0, 0], sizes = [8, 128], strides = [1, 1]} : vector<8x384xf32> to vector<8x128xf32>
    %165 = arith.addf %163, %164 : vector<8x128xf32>
    %166 = arith.negf %165 : vector<8x128xf32>
    %167 = math.exp %166 : vector<8x128xf32>
    %cst_52 = arith.constant 1.000000e+00 : f32
    %168 = vector.broadcast %cst_52 : f32 to vector<8x128xf32>
    %169 = arith.addf %168, %167 : vector<8x128xf32>
    %170 = arith.divf %168, %169 : vector<8x128xf32>
    %171 = vector.extract_strided_slice %161 {offsets = [0, 128], sizes = [8, 128], strides = [1, 1]} : vector<8x384xf32> to vector<8x128xf32>
    %172 = vector.extract_strided_slice %162 {offsets = [0, 128], sizes = [8, 128], strides = [1, 1]} : vector<8x384xf32> to vector<8x128xf32>
    %173 = arith.addf %171, %172 : vector<8x128xf32>
    %174 = arith.negf %173 : vector<8x128xf32>
    %175 = math.exp %174 : vector<8x128xf32>
    %cst_53 = arith.constant 1.000000e+00 : f32
    %176 = vector.broadcast %cst_53 : f32 to vector<8x128xf32>
    %177 = arith.addf %176, %175 : vector<8x128xf32>
    %178 = arith.divf %176, %177 : vector<8x128xf32>
    %179 = vector.extract_strided_slice %161 {offsets = [0, 256], sizes = [8, 128], strides = [1, 1]} : vector<8x384xf32> to vector<8x128xf32>
    %180 = vector.extract_strided_slice %162 {offsets = [0, 256], sizes = [8, 128], strides = [1, 1]} : vector<8x384xf32> to vector<8x128xf32>
    %181 = vector.broadcast %13 : vector<1x128xf32> to vector<8x128xf32>
    %182 = arith.addf %180, %181 : vector<8x128xf32>
    %183 = arith.mulf %170, %182 : vector<8x128xf32>
    %184 = arith.addf %179, %183 : vector<8x128xf32>
    %185 = math.tanh %184 : vector<8x128xf32>
    %cst_54 = arith.constant 1.000000e+00 : f32
    %186 = vector.broadcast %cst_54 : f32 to vector<8x128xf32>
    %187 = arith.subf %186, %178 : vector<8x128xf32>
    %188 = arith.mulf %187, %185 : vector<8x128xf32>
    %189 = arith.mulf %178, %154 : vector<8x128xf32>
    %190 = arith.addf %188, %189 : vector<8x128xf32>
    %191 = arith.index_cast %c4_i32 : i32 to index
    %c0_55 = arith.constant 0 : index
    %c0_56 = arith.constant 0 : index
    %192 = vector.load %arg7[%191, %c0_55, %c0_56] : memref<8x8x128xf32, #tpu.memory_space<vmem>>, vector<1x8x128xf32>
    %193 = vector.shape_cast %192 : vector<1x8x128xf32> to vector<8x128xf32>
    %194 = vector.shape_cast %190 : vector<8x128xf32> to vector<1x8x128xf32>
    tpu.vector_store %arg7[%191, %c0_55, %c0_56], %194 {strides = array<i32>} : memref<8x8x128xf32, #tpu.memory_space<vmem>>, vector<1x8x128xf32>,
    %c5_i32 = arith.constant 5 : i32
    %195 = arith.index_cast %c5_i32 : i32 to index
    %c0_57 = arith.constant 0 : index
    %c0_58 = arith.constant 0 : index
    %196 = vector.load %arg10[%195, %c0_57, %c0_58] : memref<8x8x384xf32, #tpu.memory_space<vmem>>, vector<1x8x384xf32>
    %197 = vector.shape_cast %196 : vector<1x8x384xf32> to vector<8x384xf32>
    %cst_59 = arith.constant dense<0.000000e+00> : vector<8x384xf32>
    %198 = tpu.matmul %190, %12, %cst_59 {dimension_numbers = #tpu.dot_dimension_numbers<[1], [0], [0], [1], [0, 0, 1, 1], [], []>} : vector<8x128xf32>, vector<128x384xf32>, vector<8x384xf32> -> vector<8x384xf32>
    %199 = vector.extract_strided_slice %197 {offsets = [0, 0], sizes = [8, 128], strides = [1, 1]} : vector<8x384xf32> to vector<8x128xf32>
    %200 = vector.extract_strided_slice %198 {offsets = [0, 0], sizes = [8, 128], strides = [1, 1]} : vector<8x384xf32> to vector<8x128xf32>
    %201 = arith.addf %199, %200 : vector<8x128xf32>
    %202 = arith.negf %201 : vector<8x128xf32>
    %203 = math.exp %202 : vector<8x128xf32>
    %cst_60 = arith.constant 1.000000e+00 : f32
    %204 = vector.broadcast %cst_60 : f32 to vector<8x128xf32>
    %205 = arith.addf %204, %203 : vector<8x128xf32>
    %206 = arith.divf %204, %205 : vector<8x128xf32>
    %207 = vector.extract_strided_slice %197 {offsets = [0, 128], sizes = [8, 128], strides = [1, 1]} : vector<8x384xf32> to vector<8x128xf32>
    %208 = vector.extract_strided_slice %198 {offsets = [0, 128], sizes = [8, 128], strides = [1, 1]} : vector<8x384xf32> to vector<8x128xf32>
    %209 = arith.addf %207, %208 : vector<8x128xf32>
    %210 = arith.negf %209 : vector<8x128xf32>
    %211 = math.exp %210 : vector<8x128xf32>
    %cst_61 = arith.constant 1.000000e+00 : f32
    %212 = vector.broadcast %cst_61 : f32 to vector<8x128xf32>
    %213 = arith.addf %212, %211 : vector<8x128xf32>
    %214 = arith.divf %212, %213 : vector<8x128xf32>
    %215 = vector.extract_strided_slice %197 {offsets = [0, 256], sizes = [8, 128], strides = [1, 1]} : vector<8x384xf32> to vector<8x128xf32>
    %216 = vector.extract_strided_slice %198 {offsets = [0, 256], sizes = [8, 128], strides = [1, 1]} : vector<8x384xf32> to vector<8x128xf32>
    %217 = vector.broadcast %13 : vector<1x128xf32> to vector<8x128xf32>
    %218 = arith.addf %216, %217 : vector<8x128xf32>
    %219 = arith.mulf %206, %218 : vector<8x128xf32>
    %220 = arith.addf %215, %219 : vector<8x128xf32>
    %221 = math.tanh %220 : vector<8x128xf32>
    %cst_62 = arith.constant 1.000000e+00 : f32
    %222 = vector.broadcast %cst_62 : f32 to vector<8x128xf32>
    %223 = arith.subf %222, %214 : vector<8x128xf32>
    %224 = arith.mulf %223, %221 : vector<8x128xf32>
    %225 = arith.mulf %214, %190 : vector<8x128xf32>
    %226 = arith.addf %224, %225 : vector<8x128xf32>
    %227 = arith.index_cast %c5_i32 : i32 to index
    %c0_63 = arith.constant 0 : index
    %c0_64 = arith.constant 0 : index
    %228 = vector.load %arg7[%227, %c0_63, %c0_64] : memref<8x8x128xf32, #tpu.memory_space<vmem>>, vector<1x8x128xf32>
    %229 = vector.shape_cast %228 : vector<1x8x128xf32> to vector<8x128xf32>
    %230 = vector.shape_cast %226 : vector<8x128xf32> to vector<1x8x128xf32>
    tpu.vector_store %arg7[%227, %c0_63, %c0_64], %230 {strides = array<i32>} : memref<8x8x128xf32, #tpu.memory_space<vmem>>, vector<1x8x128xf32>,
    %c6_i32 = arith.constant 6 : i32
    %231 = arith.index_cast %c6_i32 : i32 to index
    %c0_65 = arith.constant 0 : index
    %c0_66 = arith.constant 0 : index
    %232 = vector.load %arg10[%231, %c0_65, %c0_66] : memref<8x8x384xf32, #tpu.memory_space<vmem>>, vector<1x8x384xf32>
    %233 = vector.shape_cast %232 : vector<1x8x384xf32> to vector<8x384xf32>
    %cst_67 = arith.constant dense<0.000000e+00> : vector<8x384xf32>
    %234 = tpu.matmul %226, %12, %cst_67 {dimension_numbers = #tpu.dot_dimension_numbers<[1], [0], [0], [1], [0, 0, 1, 1], [], []>} : vector<8x128xf32>, vector<128x384xf32>, vector<8x384xf32> -> vector<8x384xf32>
    %235 = vector.extract_strided_slice %233 {offsets = [0, 0], sizes = [8, 128], strides = [1, 1]} : vector<8x384xf32> to vector<8x128xf32>
    %236 = vector.extract_strided_slice %234 {offsets = [0, 0], sizes = [8, 128], strides = [1, 1]} : vector<8x384xf32> to vector<8x128xf32>
    %237 = arith.addf %235, %236 : vector<8x128xf32>
    %238 = arith.negf %237 : vector<8x128xf32>
    %239 = math.exp %238 : vector<8x128xf32>
    %cst_68 = arith.constant 1.000000e+00 : f32
    %240 = vector.broadcast %cst_68 : f32 to vector<8x128xf32>
    %241 = arith.addf %240, %239 : vector<8x128xf32>
    %242 = arith.divf %240, %241 : vector<8x128xf32>
    %243 = vector.extract_strided_slice %233 {offsets = [0, 128], sizes = [8, 128], strides = [1, 1]} : vector<8x384xf32> to vector<8x128xf32>
    %244 = vector.extract_strided_slice %234 {offsets = [0, 128], sizes = [8, 128], strides = [1, 1]} : vector<8x384xf32> to vector<8x128xf32>
    %245 = arith.addf %243, %244 : vector<8x128xf32>
    %246 = arith.negf %245 : vector<8x128xf32>
    %247 = math.exp %246 : vector<8x128xf32>
    %cst_69 = arith.constant 1.000000e+00 : f32
    %248 = vector.broadcast %cst_69 : f32 to vector<8x128xf32>
    %249 = arith.addf %248, %247 : vector<8x128xf32>
    %250 = arith.divf %248, %249 : vector<8x128xf32>
    %251 = vector.extract_strided_slice %233 {offsets = [0, 256], sizes = [8, 128], strides = [1, 1]} : vector<8x384xf32> to vector<8x128xf32>
    %252 = vector.extract_strided_slice %234 {offsets = [0, 256], sizes = [8, 128], strides = [1, 1]} : vector<8x384xf32> to vector<8x128xf32>
    %253 = vector.broadcast %13 : vector<1x128xf32> to vector<8x128xf32>
    %254 = arith.addf %252, %253 : vector<8x128xf32>
    %255 = arith.mulf %242, %254 : vector<8x128xf32>
    %256 = arith.addf %251, %255 : vector<8x128xf32>
    %257 = math.tanh %256 : vector<8x128xf32>
    %cst_70 = arith.constant 1.000000e+00 : f32
    %258 = vector.broadcast %cst_70 : f32 to vector<8x128xf32>
    %259 = arith.subf %258, %250 : vector<8x128xf32>
    %260 = arith.mulf %259, %257 : vector<8x128xf32>
    %261 = arith.mulf %250, %226 : vector<8x128xf32>
    %262 = arith.addf %260, %261 : vector<8x128xf32>
    %263 = arith.index_cast %c6_i32 : i32 to index
    %c0_71 = arith.constant 0 : index
    %c0_72 = arith.constant 0 : index
    %264 = vector.load %arg7[%263, %c0_71, %c0_72] : memref<8x8x128xf32, #tpu.memory_space<vmem>>, vector<1x8x128xf32>
    %265 = vector.shape_cast %264 : vector<1x8x128xf32> to vector<8x128xf32>
    %266 = vector.shape_cast %262 : vector<8x128xf32> to vector<1x8x128xf32>
    tpu.vector_store %arg7[%263, %c0_71, %c0_72], %266 {strides = array<i32>} : memref<8x8x128xf32, #tpu.memory_space<vmem>>, vector<1x8x128xf32>,
    %c7_i32 = arith.constant 7 : i32
    %267 = arith.index_cast %c7_i32 : i32 to index
    %c0_73 = arith.constant 0 : index
    %c0_74 = arith.constant 0 : index
    %268 = vector.load %arg10[%267, %c0_73, %c0_74] : memref<8x8x384xf32, #tpu.memory_space<vmem>>, vector<1x8x384xf32>
    %269 = vector.shape_cast %268 : vector<1x8x384xf32> to vector<8x384xf32>
    %cst_75 = arith.constant dense<0.000000e+00> : vector<8x384xf32>
    %270 = tpu.matmul %262, %12, %cst_75 {dimension_numbers = #tpu.dot_dimension_numbers<[1], [0], [0], [1], [0, 0, 1, 1], [], []>} : vector<8x128xf32>, vector<128x384xf32>, vector<8x384xf32> -> vector<8x384xf32>
    %271 = vector.extract_strided_slice %269 {offsets = [0, 0], sizes = [8, 128], strides = [1, 1]} : vector<8x384xf32> to vector<8x128xf32>
    %272 = vector.extract_strided_slice %270 {offsets = [0, 0], sizes = [8, 128], strides = [1, 1]} : vector<8x384xf32> to vector<8x128xf32>
    %273 = arith.addf %271, %272 : vector<8x128xf32>
    %274 = arith.negf %273 : vector<8x128xf32>
    %275 = math.exp %274 : vector<8x128xf32>
    %cst_76 = arith.constant 1.000000e+00 : f32
    %276 = vector.broadcast %cst_76 : f32 to vector<8x128xf32>
    %277 = arith.addf %276, %275 : vector<8x128xf32>
    %278 = arith.divf %276, %277 : vector<8x128xf32>
    %279 = vector.extract_strided_slice %269 {offsets = [0, 128], sizes = [8, 128], strides = [1, 1]} : vector<8x384xf32> to vector<8x128xf32>
    %280 = vector.extract_strided_slice %270 {offsets = [0, 128], sizes = [8, 128], strides = [1, 1]} : vector<8x384xf32> to vector<8x128xf32>
    %281 = arith.addf %279, %280 : vector<8x128xf32>
    %282 = arith.negf %281 : vector<8x128xf32>
    %283 = math.exp %282 : vector<8x128xf32>
    %cst_77 = arith.constant 1.000000e+00 : f32
    %284 = vector.broadcast %cst_77 : f32 to vector<8x128xf32>
    %285 = arith.addf %284, %283 : vector<8x128xf32>
    %286 = arith.divf %284, %285 : vector<8x128xf32>
    %287 = vector.extract_strided_slice %269 {offsets = [0, 256], sizes = [8, 128], strides = [1, 1]} : vector<8x384xf32> to vector<8x128xf32>
    %288 = vector.extract_strided_slice %270 {offsets = [0, 256], sizes = [8, 128], strides = [1, 1]} : vector<8x384xf32> to vector<8x128xf32>
    %289 = vector.broadcast %13 : vector<1x128xf32> to vector<8x128xf32>
    %290 = arith.addf %288, %289 : vector<8x128xf32>
    %291 = arith.mulf %278, %290 : vector<8x128xf32>
    %292 = arith.addf %287, %291 : vector<8x128xf32>
    %293 = math.tanh %292 : vector<8x128xf32>
    %cst_78 = arith.constant 1.000000e+00 : f32
    %294 = vector.broadcast %cst_78 : f32 to vector<8x128xf32>
    %295 = arith.subf %294, %286 : vector<8x128xf32>
    %296 = arith.mulf %295, %293 : vector<8x128xf32>
    %297 = arith.mulf %286, %262 : vector<8x128xf32>
    %298 = arith.addf %296, %297 : vector<8x128xf32>
    %299 = arith.index_cast %c7_i32 : i32 to index
    %c0_79 = arith.constant 0 : index
    %c0_80 = arith.constant 0 : index
    %300 = vector.load %arg7[%299, %c0_79, %c0_80] : memref<8x8x128xf32, #tpu.memory_space<vmem>>, vector<1x8x128xf32>
    %301 = vector.shape_cast %300 : vector<1x8x128xf32> to vector<8x128xf32>
    %302 = vector.shape_cast %298 : vector<8x128xf32> to vector<1x8x128xf32>
    tpu.vector_store %arg7[%299, %c0_79, %c0_80], %302 {strides = array<i32>} : memref<8x8x128xf32, #tpu.memory_space<vmem>>, vector<1x8x128xf32>,
    %c8_i32 = arith.constant 8 : i32
    %c0_81 = arith.constant 0 : index
    %c0_82 = arith.constant 0 : index
    %303 = vector.load %arg9[%c0_81, %c0_82] : memref<8x128xf32, #tpu.memory_space<vmem>>, vector<8x128xf32>
    tpu.vector_store %arg9[%c0_81, %c0_82], %298 {strides = array<i32>} : memref<8x128xf32, #tpu.memory_space<vmem>>, vector<8x128xf32>,
    %c0_83 = arith.constant 0 : index
    %c0_84 = arith.constant 0 : index
    %304 = vector.load %arg8[%c0_83, %c0_84] : memref<8x128xf32, #tpu.memory_space<vmem>>, vector<8x128xf32>
    tpu.vector_store %arg8[%c0_83, %c0_84], %298 {strides = array<i32>} : memref<8x128xf32, #tpu.memory_space<vmem>>, vector<8x128xf32>,
    return
  }
  func.func @transform_0(%arg0: i32) -> (i32, i32, i32) {
    %c0_i32 = arith.constant 0 : i32
    %c0_i32_0 = arith.constant 0 : i32
    %c0_i32_1 = arith.constant 0 : i32
    return %arg0, %c0_i32, %c0_i32_0 : i32, i32, i32
  }
  func.func @transform_1(%arg0: i32) -> (i32, i32) {
    %c0_i32 = arith.constant 0 : i32
    %c0_i32_0 = arith.constant 0 : i32
    %c0_i32_1 = arith.constant 0 : i32
    return %c0_i32, %c0_i32_0 : i32, i32
  }
  func.func @transform_2(%arg0: i32) -> (i32, i32) {
    %c0_i32 = arith.constant 0 : i32
    %c0_i32_0 = arith.constant 0 : i32
    %c0_i32_1 = arith.constant 0 : i32
    return %c0_i32, %c0_i32_0 : i32, i32
  }
  func.func @transform_3(%arg0: i32) -> (i32, i32) {
    %c0_i32 = arith.constant 0 : i32
    %c0_i32_0 = arith.constant 0 : i32
    %c0_i32_1 = arith.constant 0 : i32
    return %c0_i32, %c0_i32_0 : i32, i32
  }
  func.func @transform_4(%arg0: i32) -> (i32, i32) {
    %c0_i32 = arith.constant 0 : i32
    %c0_i32_0 = arith.constant 0 : i32
    %c0_i32_1 = arith.constant 0 : i32
    return %c0_i32, %c0_i32_0 : i32, i32
  }
  func.func @transform_5(%arg0: i32) -> (i32, i32) {
    %c0_i32 = arith.constant 0 : i32
    %c0_i32_0 = arith.constant 0 : i32
    %c0_i32_1 = arith.constant 0 : i32
    return %c0_i32, %c0_i32_0 : i32, i32
  }
  func.func @transform_6(%arg0: i32) -> (i32, i32, i32) {
    %c0_i32 = arith.constant 0 : i32
    %c0_i32_0 = arith.constant 0 : i32
    %c0_i32_1 = arith.constant 0 : i32
    return %arg0, %c0_i32, %c0_i32_0 : i32, i32, i32
  }
  func.func @transform_7(%arg0: i32) -> (i32, i32) {
    %c0_i32 = arith.constant 0 : i32
    %c0_i32_0 = arith.constant 0 : i32
    %c0_i32_1 = arith.constant 0 : i32
    return %c0_i32, %c0_i32_0 : i32, i32
  }
}

</mosaic_0001>

<bundles_post_ra>
// kernel: tpu_custom_call.1
= control target key start
LH: loop header
LB: loop body
LE: loop exit
PB: predicated region body
PF: predicated region fallthrough
CT: control target
= control target key end

     0   :  { %13 = vsyncpa [#allocation5], 0  ;;  %s3643_s0 = inlined_call_operand.hbm [shape: f32[8,8,128], index: 0, kind: input, shape index: {}]   ;;  %s3644_s1 = inlined_call_operand.hbm [shape: f32[128,384], index: 1, kind: input, shape index: {}]   ;;  %s3645_s2 = inlined_call_operand.hbm [shape: f32[128,384], index: 2, kind: input, shape index: {}]   ;;  %s3646_s3 = inlined_call_operand.vmem [shape: f32[1,384], index: 3, kind: input, shape index: {}]   ;;  %s3647_s4 = inlined_call_operand.vmem [shape: f32[1,128], index: 4, kind: input, shape index: {}]   ;;  %s3648_s5 = inlined_call_operand.vmem [shape: f32[8,128], index: 5, kind: input, shape index: {}]   ;;  %s3649_s6 = inlined_call_operand.hbm [shape: f32[8,8,128], index: 6, kind: output, shape index: {0}]   ;;  %s3650_s7 = inlined_call_operand.hbm [shape: f32[8,128], index: 7, kind: output, shape index: {1}]  }
   0x1   :  { %14 = vsyncpa [#allocation8], 0 }
   0x2   :  { %15 = vsyncpa [#allocation6], 0 }
   0x3   :  { %16 = vsyncpa [#allocation12], 0  ;;  %s3084_s24 = smov [#allocation7]   ;;  %s2966_s28 = scalar_lea.hbm %s3644_s1, 6144 }
   0x4   :  { %s34_s25 = sshll.u32 %s3084_s24, 4  ;;  %p2967_p0 = scmp.ne.s32.totalorder %s3644_s1, %s2966_s28  ;;  %s35_s25 = int_to_ptr.vmem [resolvable:$true] %s34_s25 }
   0x5   :  { %p2970_p1 = scmp.lt.u32.totalorder %s2966_s28, %s3644_s1 }
   0x7   :  { %p2972_p2 = pnand %p2970_p1, %p2967_p0 }
   0x9   :  { %2975 = shalt.err (!%p2972_p2)
}
   0xa   :  { %s2976_s10 = scalar_lea.vmem %s35_s25, 6144  ;;  %p2981_p4 = scmp.lt.s32.totalorder %s35_s25, %s35_s25 }
   0xb   :  { %p2977_p3 = scmp.ne.s32.totalorder %s35_s25, %s2976_s10  ;;  %p2982_p5 = scmp.lt.s32.totalorder %s2976_s10, %s2976_s10 }
   0xd   :  { %p2983_p6 = por %p2982_p5, %p2981_p4 }
   0xf   :  { %p2984_p7 = pnand %p2983_p6, %p2977_p3 }
  0x11   :  { %2987 = shalt.err (!%p2984_p7)
}
  0x12   :  { %s3085_s11 = smov 384   ;;  %s3086_s12 = smov 24  }
  0x13   :  { %40 = dma.hbm_to_vmem [thread:$0]  %s3644_s1, 6144, %s35_s25, [#allocation8], %s3085_s11, %s3085_s11, %s3086_s12  }
  0x14   :  { %s3087_s15 = smov [#allocation4]   ;;  %s2988_s19 = scalar_lea.hbm %s3643_s0, 1024 }
  0x15   :  { %s22_s16 = sshll.u32 %s3087_s15, 4  ;;  %p2989_p8 = scmp.ne.s32.totalorder %s3643_s0, %s2988_s19  ;;  %s23_s16 = int_to_ptr.vmem [resolvable:$true] %s22_s16 }
  0x16   :  { %p2992_p9 = scmp.lt.u32.totalorder %s2988_s19, %s3643_s0 }
  0x18   :  { %p2994_p10 = pnand %p2992_p9, %p2989_p8 }
  0x1a   :  { %2997 = shalt.err (!%p2994_p10)
}
  0x1b   :  { %s2998_s24 = scalar_lea.vmem %s23_s16, 1024  ;;  %p3003_p12 = scmp.lt.s32.totalorder %s23_s16, %s23_s16 }
  0x1c   :  { %p2999_p11 = scmp.ne.s32.totalorder %s23_s16, %s2998_s24  ;;  %p3004_p13 = scmp.lt.s32.totalorder %s2998_s24, %s2998_s24 }
  0x1e   :  { %p3005_p0 = por %p3004_p13, %p3003_p12 }
  0x20   :  { %p3006_p1 = pnand %p3005_p0, %p2999_p11 }
  0x22   :  { %3009 = shalt.err (!%p3006_p1)
}
  0x23   :  { %s3088_s1 = smov 128   ;;  %s3089_s25 = smov 8  }
  0x24   :  { %28 = dma.hbm_to_vmem [thread:$0]  %s3643_s0, 1024, %s23_s16, [#allocation5], %s3088_s1, %s3088_s1, %s3089_s25  }
  0x25   :  { %s3090_s28 = smov [#allocation9]   ;;  %s3010_s9 = scalar_lea.hbm %s3645_s2, 6144 }
  0x26   :  { %s46_s29 = sshll.u32 %s3090_s28, 4  ;;  %p3011_p2 = scmp.ne.s32.totalorder %s3645_s2, %s3010_s9  ;;  %s47_s29 = int_to_ptr.vmem [resolvable:$true] %s46_s29 }
  0x27   :  { %p3014_p3 = scmp.lt.u32.totalorder %s3010_s9, %s3645_s2 }
  0x29   :  { %p3016_p4 = pnand %p3014_p3, %p3011_p2 }
  0x2b   :  { %3019 = shalt.err (!%p3016_p4)
}
  0x2c   :  { %s3020_s17 = scalar_lea.vmem %s47_s29, 6144  ;;  %p3025_p6 = scmp.lt.s32.totalorder %s47_s29, %s47_s29 }
  0x2d   :  { %p3021_p5 = scmp.ne.s32.totalorder %s47_s29, %s3020_s17  ;;  %p3026_p7 = scmp.lt.s32.totalorder %s3020_s17, %s3020_s17 }
  0x2f   :  { %p3027_p8 = por %p3026_p7, %p3025_p6 }
  0x31   :  { %p3028_p9 = pnand %p3027_p8, %p3021_p5 }
  0x33   :  { %3031 = shalt.err (!%p3028_p9)
}
  0x34   :  { %52 = dma.hbm_to_vmem [thread:$0]  %s3645_s2, 6144, %s47_s29, [#allocation8], %s3085_s11, %s3085_s11, %s3086_s12  }
  0x35   :  { %3076 = dma.done.wait [#allocation5], 1024  }
  0x36   :  { %3077 = vsyncadd [#allocation5], 4294966272 }
  0x37   :  { %3078 = dma.done.wait [#allocation8], 12288  }
  0x38   :  { %3079 = vsyncadd [#allocation8], 4294955008  ;;  %v3091_v0 = vmov 0.0   ;;  %v83_v1 = vld [vmem:[#allocation7 + $0x8] sm:$0xff]  ;;  %v86_v2 = vld [vmem:[#allocation7 + $0x20] sm:$0xff]  ;;  %vm3093_vm0 = vmmov 0  }
  0x39   :  { %211 = vmatprep.mubr.f32.mxu0 %v3091_v0  ;;  %v82_v3 = vld [vmem:[#allocation7] sm:$0xff]  ;;  %v2330_v4 = vpack.c.bf16 %v86_v2, %v83_v1  ;;  %v85_v5 = vld [vmem:[#allocation7 + $0x18] sm:$0xff]  ;;  %v92_v7 = vld [vmem:[#allocation7 + $0x50] sm:$0xff]  ;;  %s3095_s20 = smov [#allocation11]  }
  0x3a   :  { %v89_v6 = vld [vmem:[#allocation7 + $0x38] sm:$0xff]  ;;  %v2332_v8 = vpack.c.bf16 %v85_v5, %v82_v3  ;;  %v88_v10 = vld [vmem:[#allocation7 + $0x30] sm:$0xff]  ;;  %v91_v11 = vld [vmem:[#allocation7 + $0x48] sm:$0xff]  ;;  %s1815_s21 = sshll.u32 %s3095_s20, 4  ;;  %s1816_s21 = int_to_ptr.vmem [resolvable:$true] %s1815_s21 }
  0x3b   :  { %v2334_v9 = vpack.c.bf16 %v92_v7, %v89_v6  ;;  %v95_v12 = vld [vmem:[#allocation7 + $0x68] sm:$0xff]  ;;  %2331 = vmatprep.subr.bf16.mxu0 %v2330_v4  ;;  %v98_v13 = vld [vmem:[#allocation7 + $0x80] sm:$0xff]  ;;  %v2336_v14 = vpack.c.bf16 %v91_v11, %v88_v10  ;;  %v97_v17 = vld [vmem:[#allocation7 + $0x78] sm:$0xff] }
  0x3c   :  { %2333 = vmatpush1.bf16.msra.mxu0 %v2332_v8  ;;  %v2338_v15 = vpack.c.bf16 %v98_v13, %v95_v12  ;;  %v94_v16 = vld [vmem:[#allocation7 + $0x60] sm:$0xff]  ;;  %v101_v18 = vld [vmem:[#allocation7 + $0x98] sm:$0xff]  ;;  %v104_v19 = vld [vmem:[#allocation7 + $0xb0] sm:$0xff] }
  0x3d   :  { %2335 = vmatprep.subr.bf16.mxu0 %v2334_v9  ;;  %v2340_v20 = vpack.c.bf16 %v97_v17, %v94_v16  ;;  %v100_v21 = vld [vmem:[#allocation7 + $0x90] sm:$0xff]  ;;  %v2342_v22 = vpack.c.bf16 %v104_v19, %v101_v18  ;;  %v103_v23 = vld [vmem:[#allocation7 + $0xa8] sm:$0xff]  ;;  %v110_v27 = vld [vmem:[#allocation7 + $0xe0] sm:$0xff] }
  0x3e   :  { %v84_v24 = vld [vmem:[#allocation7 + $0x10] sm:$0xff]  ;;  %v87_v25 = vld [vmem:[#allocation7 + $0x28] sm:$0xff]  ;;  %v90_v29 = vld [vmem:[#allocation7 + $0x40] sm:$0xff]  ;;  %v2344_v31 = vpack.c.bf16 %v103_v23, %v100_v21 }
  0x3f   :  { %v107_v26 = vld [vmem:[#allocation7 + $0xc8] sm:$0xff]  ;;  %v2362_v28 = vpack.c.bf16 %v87_v25, %v84_v24  ;;  %v93_v30 = vld [vmem:[#allocation7 + $0x58] sm:$0xff]  ;;  %v106_v32 = vld [vmem:[#allocation7 + $0xc0] sm:$0xff] }
  0x40   :  { %2337 = vmatpush1.bf16.msra.mxu0 %v2336_v14  ;;  %v2366_v33 = vpack.c.bf16 %v93_v30, %v90_v29  ;;  %v2346_v34 = vpack.c.bf16 %v110_v27, %v107_v26  ;;  %v109_v35 = vld [vmem:[#allocation7 + $0xd8] sm:$0xff]  ;;  %v3182_v36 = vld [vmem:[#allocation4] sm:$0xff]  ;;  %v96_v37 = vld [vmem:[#allocation7 + $0x70] sm:$0xff] }
  0x41   :  { %2339 = vmatprep.subr.bf16.mxu0 %v2338_v15  ;;  %2363 = vmatprep.subr.bf16.mxu1 %v2362_v28  ;;  %v113_v38 = vld [vmem:[#allocation7 + $0xf8] sm:$0xff]  ;;  %v116_v39 = vld [vmem:[#allocation7 + $0x110] sm:$0xff]  ;;  %v99_v40 = vld [vmem:[#allocation7 + $0x88] sm:$0xff]  ;;  %v2348_v42 = vpack.c.bf16 %v109_v35, %v106_v32 }
  0x42   :  { %2365 = vmatpush3.bf16.msra.mxu1 %v2362_v28  ;;  %2038 = vmatprep.mubr.f32.mxu1 %v3182_v36  ;;  %v2370_v41 = vpack.c.bf16 %v99_v40, %v96_v37  ;;  %v102_v43 = vld [vmem:[#allocation7 + $0xa0] sm:$0xff]  ;;  %v105_v44 = vld [vmem:[#allocation7 + $0xb8] sm:$0xff]  ;;  %v2350_v45 = vpack.c.bf16 %v116_v39, %v113_v38  ;;  %v112_v46 = vld [vmem:[#allocation7 + $0xf0] sm:$0xff]  ;;  %v3092_v40 = vmov 0.0|0.0  }
  0x43   :  { %2367 = vmatprep.subr.bf16.mxu1 %v2366_v33  ;;  %v115_v47 = vld [vmem:[#allocation7 + $0x108] sm:$0xff]  ;;  %v122_v49 = vld [vmem:[#allocation7 + $0x140] sm:$0xff]  ;;  %v2374_v50 = vpack.c.bf16 %v105_v44, %v102_v43  ;;  %v108_v51 = vld [vmem:[#allocation7 + $0xd0] sm:$0xff] }
  0x44   :  { %2341 = vmatpush1.bf16.msra.mxu0 %v2340_v20  ;;  %v119_v48 = vld [vmem:[#allocation7 + $0x128] sm:$0xff]  ;;  %v2352_v53 = vpack.c.bf16 %v115_v47, %v112_v46  ;;  %v118_v55 = vld [vmem:[#allocation7 + $0x120] sm:$0xff]  ;;  %v121_v56 = vld [vmem:[#allocation7 + $0x138] sm:$0xff] }
  0x45   :  { %2343 = vmatprep.subr.bf16.mxu0 %v2342_v22  ;;  %v111_v52 = vld [vmem:[#allocation7 + $0xe8] sm:$0xff]  ;;  %v2354_v54 = vpack.c.bf16 %v122_v49, %v119_v48  ;;  %v125_v57 = vld [vmem:[#allocation7 + $0x158] sm:$0xff]  ;;  %v128_v58 = vld [vmem:[#allocation7 + $0x170] sm:$0xff]  ;;  %v2356_v62 = vpack.c.bf16 %v121_v56, %v118_v55 }
  0x46   :  { %2369 = vmatpush3.bf16.msra.mxu1 %v2366_v33  ;;  %v2378_v59 = vpack.c.bf16 %v111_v52, %v108_v51  ;;  %v114_v60 = vld [vmem:[#allocation7 + $0x100] sm:$0xff]  ;;  %v117_v61 = vld [vmem:[#allocation7 + $0x118] sm:$0xff]  ;;  %v2358_v63 = vpack.c.bf16 %v128_v58, %v125_v57  ;;  %v124_v1 = vld [vmem:[#allocation7 + $0x150] sm:$0xff] }
  0x47   :  { %2371 = vmatprep.subr.bf16.mxu1 %v2370_v41  ;;  %v127_v2 = vld [vmem:[#allocation7 + $0x168] sm:$0xff]  ;;  %v393_v4 = vld [vmem:[#allocation9 + $0x20] sm:$0xff]  ;;  %v2382_v5 = vpack.c.bf16 %v117_v61, %v114_v60  ;;  %v120_v6 = vld [vmem:[#allocation7 + $0x130] sm:$0xff] }
  0x48   :  { %2345 = vmatpush1.bf16.msra.mxu0 %v2344_v31  ;;  %v390_v3 = vld [vmem:[#allocation9 + $0x8] sm:$0xff]  ;;  %v2360_v8 = vpack.c.bf16 %v127_v2, %v124_v1  ;;  %v389_v10 = vld [vmem:[#allocation9] sm:$0xff]  ;;  %v392_v11 = vld [vmem:[#allocation9 + $0x18] sm:$0xff] }
  0x49   :  { %2347 = vmatprep.subr.bf16.mxu0 %v2346_v34  ;;  %v123_v7 = vld [vmem:[#allocation7 + $0x148] sm:$0xff]  ;;  %v3185_v9 = vpack.c.bf16 %v393_v4, %v390_v3  ;;  %v396_v12 = vld [vmem:[#allocation9 + $0x38] sm:$0xff]  ;;  %v399_v13 = vld [vmem:[#allocation9 + $0x50] sm:$0xff]  ;;  %v3187_v17 = vpack.c.bf16 %v392_v11, %v389_v10 }
  0x4a   :  { %2373 = vmatpush3.bf16.msra.mxu1 %v2370_v41  ;;  %v2386_v14 = vpack.c.bf16 %v123_v7, %v120_v6  ;;  %v126_v15 = vld [vmem:[#allocation7 + $0x160] sm:$0xff]  ;;  %v129_v16 = vld [vmem:[#allocation7 + $0x178] sm:$0xff]  ;;  %v3190_v18 = vpack.c.bf16 %v399_v13, %v396_v12  ;;  %v395_v19 = vld [vmem:[#allocation9 + $0x30] sm:$0xff] }
  0x4b   :  { %2375 = vmatprep.subr.bf16.mxu1 %v2374_v50  ;;  %v398_v20 = vld [vmem:[#allocation9 + $0x48] sm:$0xff]  ;;  %v405_v22 = vld [vmem:[#allocation9 + $0x80] sm:$0xff]  ;;  %v2390_v23 = vpack.c.bf16 %v129_v16, %v126_v15  ;;  %v404_v28 = vld [vmem:[#allocation9 + $0x78] sm:$0xff] }
  0x4c   :  { %2349 = vmatpush1.bf16.msra.mxu0 %v2348_v42  ;;  %v402_v21 = vld [vmem:[#allocation9 + $0x68] sm:$0xff]  ;;  %v3195_v25 = vpack.c.bf16 %v398_v20, %v395_v19  ;;  %v401_v27 = vld [vmem:[#allocation9 + $0x60] sm:$0xff]  ;;  %v408_v29 = vld [vmem:[#allocation9 + $0x98] sm:$0xff] }
  0x4d   :  { %2351 = vmatprep.subr.bf16.mxu0 %v2350_v45  ;;  %v75_v24 = vld [vmem:[#allocation4 + $0x8] sm:$0xff]  ;;  %v3198_v26 = vpack.c.bf16 %v405_v22, %v402_v21  ;;  %v411_v30 = vld [vmem:[#allocation9 + $0xb0] sm:$0xff]  ;;  %v3202_v34 = vpack.c.bf16 %v404_v28, %v401_v27  ;;  %v417_v39 = vld [vmem:[#allocation9 + $0xe0] sm:$0xff] }
  0x4e   :  { %2377 = vmatpush3.bf16.msra.mxu1 %v2374_v50  ;;  %v391_v31 = vld [vmem:[#allocation9 + $0x10] sm:$0xff]  ;;  %v394_v32 = vld [vmem:[#allocation9 + $0x28] sm:$0xff]  ;;  %v3205_v35 = vpack.c.bf16 %v411_v30, %v408_v29  ;;  %v397_v42 = vld [vmem:[#allocation9 + $0x40] sm:$0xff] }
  0x4f   :  { %2379 = vmatprep.subr.bf16.mxu1 %v2378_v59  ;;  %v76_v33 = vld [vmem:[#allocation4 + $0x10] sm:$0xff]  ;;  %v410_v37 = vld [vmem:[#allocation9 + $0xa8] sm:$0xff]  ;;  %v3208_v41 = vpack.c.bf16 %v394_v32, %v391_v31  ;;  %v400_v43 = vld [vmem:[#allocation9 + $0x58] sm:$0xff] }
  0x50   :  { %2353 = vmatpush1.bf16.msra.mxu0 %v2352_v53  ;;  %v414_v38 = vld [vmem:[#allocation9 + $0xc8] sm:$0xff]  ;;  %v77_v44 = vld [vmem:[#allocation4 + $0x18] sm:$0xff]  ;;  %v413_v47 = vld [vmem:[#allocation9 + $0xc0] sm:$0xff]  ;;  %v3218_v51 = vpack.c.bf16 %v400_v43, %v397_v42 }
  0x51   :  { %2355 = vmatprep.subr.bf16.mxu0 %v2354_v54  ;;  %v3215_v46 = vpack.c.bf16 %v417_v39, %v414_v38  ;;  %v416_v48 = vld [vmem:[#allocation9 + $0xd8] sm:$0xff]  ;;  %v423_v50 = vld [vmem:[#allocation9 + $0x110] sm:$0xff]  ;;  %v406_v53 = vld [vmem:[#allocation9 + $0x88] sm:$0xff] }
  0x52   :  { %2381 = vmatpush3.bf16.msra.mxu1 %v2378_v59  ;;  %v420_v49 = vld [vmem:[#allocation9 + $0xf8] sm:$0xff]  ;;  %v403_v52 = vld [vmem:[#allocation9 + $0x70] sm:$0xff]  ;;  %v78_v54 = vld [vmem:[#allocation4 + $0x20] sm:$0xff]  ;;  %v3223_v55 = vpack.c.bf16 %v416_v48, %v413_v47 }
  0x53   :  { %2383 = vmatprep.subr.bf16.mxu1 %v2382_v5  ;;  %v3226_v56 = vpack.c.bf16 %v423_v50, %v420_v49  ;;  %v419_v57 = vld [vmem:[#allocation9 + $0xf0] sm:$0xff]  ;;  %v422_v58 = vld [vmem:[#allocation9 + $0x108] sm:$0xff]  ;;  %v429_v60 = vld [vmem:[#allocation9 + $0x140] sm:$0xff]  ;;  %v3229_v61 = vpack.c.bf16 %v406_v53, %v403_v52 }
  0x54   :  { %2357 = vmatpush1.bf16.msra.mxu0 %v2356_v62  ;;  %v426_v59 = vld [vmem:[#allocation9 + $0x128] sm:$0xff]  ;;  %v409_v62 = vld [vmem:[#allocation9 + $0xa0] sm:$0xff]  ;;  %v3234_v2 = vpack.c.bf16 %v422_v58, %v419_v57  ;;  %v80_v3 = vld [vmem:[#allocation4 + $0x30] sm:$0xff] }
  0x55   :  { %2359 = vmatprep.subr.bf16.mxu0 %v2358_v63  ;;  %v412_v63 = vld [vmem:[#allocation9 + $0xb8] sm:$0xff]  ;;  %v79_v1 = vld [vmem:[#allocation4 + $0x28] sm:$0xff]  ;;  %v3237_v4 = vpack.c.bf16 %v429_v60, %v426_v59  ;;  %v415_v11 = vld [vmem:[#allocation9 + $0xd0] sm:$0xff] }
  0x56   :  { %2385 = vmatpush3.bf16.msra.mxu1 %v2382_v5  ;;  %v425_v5 = vld [vmem:[#allocation9 + $0x120] sm:$0xff]  ;;  %v428_v6 = vld [vmem:[#allocation9 + $0x138] sm:$0xff]  ;;  %v3240_v10 = vpack.c.bf16 %v412_v63, %v409_v62  ;;  %v418_v12 = vld [vmem:[#allocation9 + $0xe8] sm:$0xff] }
  0x57   :  { %2387 = vmatprep.subr.bf16.mxu1 %v2386_v14  ;;  %v432_v7 = vld [vmem:[#allocation9 + $0x158] sm:$0xff]  ;;  %v3245_v13 = vpack.c.bf16 %v428_v6, %v425_v5  ;;  %v431_v16 = vld [vmem:[#allocation9 + $0x150] sm:$0xff]  ;;  %v434_v19 = vld [vmem:[#allocation9 + $0x168] sm:$0xff]  ;;  %v3251_v20 = vpack.c.bf16 %v418_v12, %v415_v11 }
  0x58   :  { %2361 = vmatpush1.bf16.msra.mxu0 %v2360_v8  ;;  %v435_v8 = vld [vmem:[#allocation9 + $0x170] sm:$0xff]  ;;  %v421_v21 = vld [vmem:[#allocation9 + $0x100] sm:$0xff]  ;;  %v424_v22 = vld [vmem:[#allocation9 + $0x118] sm:$0xff] }
  0x59   :  { %2395 = vmatprep.subr.bf16.mxu0 %v3185_v9  ;;  %v3248_v15 = vpack.c.bf16 %v435_v8, %v432_v7  ;;  %v427_v27 = vld [vmem:[#allocation9 + $0x130] sm:$0xff]  ;;  %v430_v28 = vld [vmem:[#allocation9 + $0x148] sm:$0xff]  ;;  %v3270_v29 = vld [vmem:[%s3648_s5] sm:$0xff] }
  0x5a   :  { %2389 = vmatpush3.bf16.msra.mxu1 %v2386_v14  ;;  %v81_v14 = vld [vmem:[#allocation4 + $0x38] sm:$0xff]  ;;  %v3274_v30 = vpack.c.bf16 %v430_v28, %v427_v27  ;;  %v433_v31 = vld [vmem:[#allocation9 + $0x160] sm:$0xff] }
  0x5b   :  { %212 = vmatmul.mubr.f32.vlgmr.msra.gmra.mrb[0].mxu0 %v3182_v36  ;;  %2391 = vmatprep.subr.bf16.mxu1 %v2390_v23  ;;  %v407_v36 = vld [vmem:[#allocation9 + $0x90] sm:$0xff]  ;;  %v436_v32 = vld [vmem:[#allocation9 + $0x178] sm:$0xff]  ;;  %v130_v39 = vld [vmem:[%s3646_s3] sm:$0x7] }
  0x5c   :  { %2397 = vmatpush1.bf16.msra.mxu0 %v3187_v17  ;;  %217 = vmatprep.mubr.f32.mxu0 %v3091_v0  ;;  %v3212_v45 = vpack.c.bf16 %v410_v37, %v407_v36  ;;  %v132_v36 = vlaneseq }
  0x5d   :  { %2399 = vmatprep.subr.bf16.mxu0 %v3190_v18 }
  0x5e   :  { %2393 = vmatpush3.bf16.msra.mxu1 %v2390_v23  ;;  %v3258_v23 = vpack.c.bf16 %v434_v19, %v431_v16  ;;  %v133_v37 = vshrl.u32 %v132_v36, 7 }
  0x5f   :  { %218 = vmatmul.mubr.f32.gmra.mrb[2].mxu0 %v75_v24  ;;  %2426 = vmatprep.subr.bf16.mxu1 %v3092_v40 }
  0x60   :  { %2401 = vmatpush1.bf16.msra.mxu0 %v3195_v25  ;;  %223 = vmatprep.mubr.f32.mxu0 %v3091_v0  ;;  %v142_v38 = vsub.s32 2, %v133_v37 }
  0x61   :  { %2403 = vmatprep.subr.bf16.mxu0 %v3198_v26  ;;  %2039 = vmatmul.mubr.f32.vlgmr.msra.gmra.mrb[0].mxu1 %v75_v24  ;;  %v3262_v24 = vpack.c.bf16 %v424_v22, %v421_v21 }
  0x62   :  { %2428 = vmatpush3.bf16.msra.mxu1 %v3208_v41  ;;  %2041 = vmatprep.mubr.f32.mxu1 %v76_v33  ;;  %v143_v42 = vrot.slane %v130_v39, %v142_v38 }
  0x63   :  { %224 = vmatmul.mubr.f32.gmra.mrb[4].mxu0 %v76_v33  ;;  %2429 = vmatprep.subr.bf16.mxu1 %v3092_v40  ;;  %v3282_v33 = vpack.c.bf16 %v436_v32, %v433_v31  ;;  %v3346_v31 = vld [vmem:[%s3647_s4] ss:$0 sm:$0xff]  ;;  %s3094_s4 = smov [#allocation10]  }
  0x64   :  { %2405 = vmatpush1.bf16.msra.mxu0 %v3202_v34  ;;  %229 = vmatprep.mubr.f32.mxu0 %v3091_v0  ;;  %s1802_s19 = sshll.u32 %s3094_s4, 4  ;;  %s1803_s19 = int_to_ptr.vmem [resolvable:$true] %s1802_s19 }
  0x65   :  { %2407 = vmatprep.subr.bf16.mxu0 %v3205_v35  ;;  %2042 = vmatmul.mubr.f32.gmra.mrb[2].mxu1 %v77_v44  ;;  %s3032_s22 = scalar_lea.vmem %s1803_s19, 1024  ;;  %p3037_p11 = scmp.lt.s32.totalorder %s1803_s19, %s1803_s19 }
  0x66   :  { %2431 = vmatpush3.bf16.msra.mxu1 %v3218_v51  ;;  %2044 = vmatprep.mubr.f32.mxu1 %v78_v54  ;;  %p3033_p10 = scmp.ne.s32.totalorder %s1803_s19, %s3032_s22  ;;  %p3038_p12 = scmp.lt.s32.totalorder %s3032_s22, %s3032_s22 }
  0x67   :  { %230 = vmatmul.mubr.f32.gmra.mrb[6].mxu0 %v77_v44  ;;  %2432 = vmatprep.subr.bf16.mxu1 %v3092_v40 }
  0x68   :  { %2409 = vmatpush1.bf16.msra.mxu0 %v3212_v45  ;;  %235 = vmatprep.mubr.f32.mxu0 %v3091_v0  ;;  %p3039_p13 = por %p3038_p12, %p3037_p11 }
  0x69   :  { %2411 = vmatprep.subr.bf16.mxu0 %v3215_v46  ;;  %2045 = vmatmul.mubr.f32.gmra.mrb[4].mxu1 %v79_v1 }
  0x6a   :  { %2434 = vmatpush3.bf16.msra.mxu1 %v3229_v61  ;;  %2047 = vmatprep.mubr.f32.mxu1 %v80_v3  ;;  %p3040_p0 = pnand %p3039_p13, %p3033_p10 }
  0x6b   :  { %236 = vmatmul.mubr.f32.gmra.mrb[8].mxu0 %v78_v54  ;;  %2435 = vmatprep.subr.bf16.mxu1 %v3092_v40 }
  0x6c   :  { %2413 = vmatpush1.bf16.msra.mxu0 %v3223_v55  ;;  %241 = vmatprep.mubr.f32.mxu0 %v3091_v0 }
  0x6d   :  { %2415 = vmatprep.subr.bf16.mxu0 %v3226_v56  ;;  %2048 = vmatmul.mubr.f32.gmra.mrb[6].mxu1 %v81_v14 }
  0x6e   :  { %2437 = vmatpush3.bf16.msra.mxu1 %v3240_v10  ;;  %2082 = vmatprep.mubr.msk.f32.mxu1 %vm3093_vm0, %v3091_v0 }
  0x6f   :  { %242 = vmatmul.mubr.f32.gmra.mrb[10].mxu0 %v79_v1  ;;  %2438 = vmatprep.subr.bf16.mxu1 %v3092_v40  ;;  %v134_v1 = vsub.s32 0, %v133_v37 }
  0x70   :  { %2417 = vmatpush1.bf16.msra.mxu0 %v3234_v2  ;;  %247 = vmatprep.mubr.f32.mxu0 %v3091_v0 }
  0x71   :  { %2419 = vmatprep.subr.bf16.mxu0 %v3237_v4  ;;  %v3337_v5 = vrot.slane %v130_v39, %v134_v1 }
  0x72   :  { %2440 = vmatpush3.bf16.msra.mxu1 %v3251_v20 }
  0x73   :  { %248 = vmatmul.mubr.f32.gmra.mrb[12].mxu0 %v80_v3  ;;  %2441 = vmatprep.subr.bf16.mxu1 %v3092_v40  ;;  %v138_v3 = vsub.s32 1, %v133_v37 }
  0x74   :  { %2421 = vmatpush1.bf16.msra.mxu0 %v3245_v13  ;;  %253 = vmatprep.mubr.f32.mxu0 %v3091_v0 }
  0x75   :  { %2423 = vmatprep.subr.bf16.mxu0 %v3248_v15  ;;  %v3339_v7 = vrot.slane %v130_v39, %v138_v3 }
  0x76   :  { %2443 = vmatpush3.bf16.msra.mxu1 %v3262_v24 }
  0x77   :  { %254 = vmatmul.mubr.f32.gmra.mrb[14].mxu0 %v81_v14  ;;  %2444 = vmatprep.subr.bf16.mxu1 %v3092_v40 }
  0x78   :  { %2425 = vmatpush1.bf16.msra.mxu0 %v3258_v23  ;;  %506 = vmatprep.mubr.f32.mxu0 %v3091_v0 }
  0x79   :  { %2451 = vmatprep.subr.bf16.mxu0 %v3185_v9 }
  0x7a   :  { %2446 = vmatpush3.bf16.msra.mxu1 %v3274_v30 }
  0x7b   :  { %507 = vmatmul.mubr.f32.vlgmr.msra.gmra.mrb[0].mxu0 %v3270_v29  ;;  %2447 = vmatprep.subr.bf16.mxu1 %v3092_v40 }
  0x7c   :  { %2453 = vmatpush1.bf16.msra.mxu0 %v3187_v17  ;;  %680 = vmatprep.mubr.f32.mxu0 %v3091_v0 }
  0x7d   :  { %2455 = vmatprep.subr.bf16.mxu0 %v3190_v18 }
  0x7e   :  { %2449 = vmatpush3.bf16.msra.mxu1 %v3282_v33 }
  0x7f   :  { %2482 = vmatprep.subr.bf16.mxu1 %v3092_v40 }
  0x80   :  { %2457 = vmatpush1.bf16.msra.mxu0 %v3195_v25 }
  0x81   :  { %2459 = vmatprep.subr.bf16.mxu0 %v3198_v26  ;;  %2083 = vmatmul.mubr.f32.vlgmr.msra.gmra.mrb[8].mxu1 %v3270_v29 }
  0x82   :  { %2484 = vmatpush3.bf16.msra.mxu1 %v3208_v41  ;;  %2117 = vmatprep.mubr.msk.f32.mxu1 %vm3093_vm0, %v3091_v0 }
  0x83   :  { %2485 = vmatprep.subr.bf16.mxu1 %v3092_v40 }
  0x84   :  { %2461 = vmatpush1.bf16.msra.mxu0 %v3202_v34 }
  0x85   :  { %2463 = vmatprep.subr.bf16.mxu0 %v3205_v35 }
  0x86   :  { %2487 = vmatpush3.bf16.msra.mxu1 %v3218_v51 }
  0x87   :  { %2488 = vmatprep.subr.bf16.mxu1 %v3092_v40 }
  0x88   :  { %2465 = vmatpush1.bf16.msra.mxu0 %v3212_v45 }
  0x89   :  { %2467 = vmatprep.subr.bf16.mxu0 %v3215_v46 }
  0x8a   :  { %2490 = vmatpush3.bf16.msra.mxu1 %v3229_v61 }
  0x8b   :  { %2491 = vmatprep.subr.bf16.mxu1 %v3092_v40 }
  0x8c   :  { %2469 = vmatpush1.bf16.msra.mxu0 %v3223_v55 }
  0x8d   :  { %2471 = vmatprep.subr.bf16.mxu0 %v3226_v56 }
  0x8e   :  { %2493 = vmatpush3.bf16.msra.mxu1 %v3240_v10 }
  0x8f   :  { %2494 = vmatprep.subr.bf16.mxu1 %v3092_v40 }
  0x90   :  { %2473 = vmatpush1.bf16.msra.mxu0 %v3234_v2 }
  0x91   :  { %2475 = vmatprep.subr.bf16.mxu0 %v3237_v4 }
  0x92   :  { %2496 = vmatpush3.bf16.msra.mxu1 %v3251_v20 }
  0x93   :  { %2497 = vmatprep.subr.bf16.mxu1 %v3092_v40 }
  0x94   :  { %2477 = vmatpush1.bf16.msra.mxu0 %v3245_v13 }
  0x95   :  { %2479 = vmatprep.subr.bf16.mxu0 %v3248_v15 }
  0x96   :  { %2499 = vmatpush3.bf16.msra.mxu1 %v3262_v24 }
  0x97   :  { %2500 = vmatprep.subr.bf16.mxu1 %v3092_v40 }
  0x98   :  { %2481 = vmatpush1.bf16.msra.mxu0 %v3258_v23 }
  0x99   :  { %2507 = vmatprep.subr.bf16.mxu0 %v3185_v9 }
  0x9a   :  { %2502 = vmatpush3.bf16.msra.mxu1 %v3274_v30 }
  0x9b   :  { %2503 = vmatprep.subr.bf16.mxu1 %v3092_v40 }
  0x9e   :  { %2505 = vmatpush3.bf16.msra.mxu1 %v3282_v33 }
  0x9f   :  { %2538 = vmatprep.subr.bf16.mxu1 %v3092_v40 }
 0x134   :  { %v2040_v43 = vpop.f32.mrb[0].mxu1 }
 0x135   :  { %v3323_v44 = vadd.f32 %v2040_v43, %v143_v42  ;;  %v326_v47 = vpop.f32.mrb[1].mxu1 }
 0x136   :  { %v327_v38 = vadd.f32 %v326_v47, %v143_v42 }
 0x138   :  { %v2043_v48 = vpop.f32.mrb[2].mxu1 }
 0x139   :  { %v3325_v49 = vadd.f32 %v2043_v48, %v143_v42  ;;  %v336_v50 = vpop.f32.mrb[3].mxu1 }
 0x13a   :  { %v3327_v52 = vadd.f32 %v336_v50, %v143_v42 }
 0x13c   :  { %v2046_v53 = vpop.f32.mrb[4].mxu1 }
 0x13d   :  { %v3329_v54 = vadd.f32 %v2046_v53, %v143_v42  ;;  %v346_v57 = vpop.f32.mrb[5].mxu1 }
 0x13e   :  { %v3331_v58 = vadd.f32 %v346_v57, %v143_v42 }
 0x140   :  { %v2049_v59 = vpop.f32.mrb[6].mxu1 }
 0x141   :  { %v3333_v60 = vadd.f32 %v2049_v59, %v143_v42  ;;  %v356_v62 = vpop.f32.mrb[7].mxu1 }
 0x142   :  { %v3335_v63 = vadd.f32 %v356_v62, %v143_v42 }
 0x14e   :  { %v508_v6 = vpop.f32.mrb[0].mxu0 }
 0x14f   :  { %v2842_v8 = vadd.f32 %v508_v6, %v3337_v5  ;;  %v510_v11 = vpop.f32.mrb[1].mxu0 }
 0x150   :  { %v2843_v14 = vadd.f32 %v510_v11, %v3339_v7 }
 0x151   :  { %v1829_v12 = vmul.f32 -1.442695, %v2842_v8 }
 0x152   :  { %v1830_v16 = vmul.f32 -1.442695, %v2843_v14 }
 0x153   :  { %2886 = vpow2.f32 %v1829_v12 }
 0x154   :  { %v579_v19 = vpop.f32.mrb[8].mxu1  ;;  %2888 = vpow2.f32 %v1830_v16 }
 0x155   :  { %v2084_v21 = vpop.f32.mrb[9].mxu1  ;;  %v603_v36 = vadd.f32 %v3346_v31, %v579_v19 }
 0x15d   :  { %v2887_v22 = vpop.eup %2886 }
 0x15e   :  { %v587_v27 = vadd.f32 1.0, %v2887_v22  ;;  %v2889_v28 = vpop.eup %2888 }
 0x15f   :  { %v594_v32 = vadd.f32 1.0, %v2889_v28 }
 0x160   :  { %2890 = vrcp.f32 %v587_v27 }
 0x161   :  { %2892 = vrcp.f32 %v594_v32 }
 0x16a   :  { %v2891_v37 = vpop.eup %2890 }
 0x16b   :  { %v604_v39 = vmul.f32 %v2891_v37, %v603_v36  ;;  %v2893_v48 = vpop.eup %2892 }
 0x16c   :  { %v607_v50 = vsub.f32 1.0, %v2893_v48  ;;  %v609_v59 = vmul.f32 %v2893_v48, %v3270_v29 }
 0x16d   :  { %v605_v43 = vadd.f32 %v604_v39, %v327_v38 }
 0x16f   :  { %2894 = vtanh.f32 %v605_v43 }
 0x179   :  { %v2895_v53 = vpop.eup %2894 }
 0x17a   :  { %v608_v57 = vmul.f32 %v2895_v53, %v607_v50 }
 0x17c   :  { %v3350_v62 = vadd.f32 %v609_v59, %v608_v57 }
 0x17e   :  { %611 = vst [vmem:[#allocation10] sm:$0xff] %v3350_v62  ;;  %681 = vmatmul.mubr.f32.vlgmr.msra.gmra.mrb[2].mxu0 %v3350_v62  ;;  %2118 = vmatmul.mubr.f32.vlgmr.msra.gmra.mrb[10].mxu1 %v3350_v62 }
 0x17f   :  { %2509 = vmatpush1.bf16.msra.mxu0 %v3187_v17  ;;  %2540 = vmatpush3.bf16.msra.mxu1 %v3208_v41 }
 0x180   :  { %2511 = vmatprep.subr.bf16.mxu0 %v3190_v18  ;;  %2541 = vmatprep.subr.bf16.mxu1 %v3092_v40 }
 0x181   :  { %849 = vmatprep.mubr.f32.mxu0 %v3091_v0  ;;  %2152 = vmatprep.mubr.msk.f32.mxu1 %vm3093_vm0, %v3091_v0 }
 0x183   :  { %2513 = vmatpush1.bf16.msra.mxu0 %v3195_v25  ;;  %2543 = vmatpush3.bf16.msra.mxu1 %v3218_v51 }
 0x184   :  { %2515 = vmatprep.subr.bf16.mxu0 %v3198_v26  ;;  %2544 = vmatprep.subr.bf16.mxu1 %v3092_v40 }
 0x187   :  { %2517 = vmatpush1.bf16.msra.mxu0 %v3202_v34  ;;  %2546 = vmatpush3.bf16.msra.mxu1 %v3229_v61 }
 0x188   :  { %2519 = vmatprep.subr.bf16.mxu0 %v3205_v35  ;;  %2547 = vmatprep.subr.bf16.mxu1 %v3092_v40 }
 0x18b   :  { %2521 = vmatpush1.bf16.msra.mxu0 %v3212_v45  ;;  %2549 = vmatpush3.bf16.msra.mxu1 %v3240_v10 }
 0x18c   :  { %2523 = vmatprep.subr.bf16.mxu0 %v3215_v46  ;;  %2550 = vmatprep.subr.bf16.mxu1 %v3092_v40 }
 0x18f   :  { %2525 = vmatpush1.bf16.msra.mxu0 %v3223_v55  ;;  %2552 = vmatpush3.bf16.msra.mxu1 %v3251_v20 }
 0x190   :  { %2527 = vmatprep.subr.bf16.mxu0 %v3226_v56  ;;  %2553 = vmatprep.subr.bf16.mxu1 %v3092_v40 }
 0x193   :  { %2529 = vmatpush1.bf16.msra.mxu0 %v3234_v2  ;;  %2555 = vmatpush3.bf16.msra.mxu1 %v3262_v24 }
 0x194   :  { %2531 = vmatprep.subr.bf16.mxu0 %v3237_v4  ;;  %2556 = vmatprep.subr.bf16.mxu1 %v3092_v40 }
 0x197   :  { %2533 = vmatpush1.bf16.msra.mxu0 %v3245_v13  ;;  %2558 = vmatpush3.bf16.msra.mxu1 %v3274_v30 }
 0x198   :  { %2535 = vmatprep.subr.bf16.mxu0 %v3248_v15  ;;  %2559 = vmatprep.subr.bf16.mxu1 %v3092_v40 }
 0x19b   :  { %2537 = vmatpush1.bf16.msra.mxu0 %v3258_v23  ;;  %2561 = vmatpush3.bf16.msra.mxu1 %v3282_v33 }
 0x19c   :  { %2563 = vmatprep.subr.bf16.mxu0 %v3185_v9  ;;  %2594 = vmatprep.subr.bf16.mxu1 %v3092_v40 }
 0x251   :  { %v682_v29 = vpop.f32.mrb[2].mxu0  ;;  %v753_v42 = vpop.f32.mrb[10].mxu1 }
 0x252   :  { %v2844_v47 = vadd.f32 %v682_v29, %v3337_v5  ;;  %v684_v1 = vpop.f32.mrb[3].mxu0  ;;  %v2119_v3 = vpop.f32.mrb[11].mxu1  ;;  %v771_v21 = vadd.f32 %v3346_v31, %v753_v42 }
 0x253   :  { %v2845_v8 = vadd.f32 %v684_v1, %v3339_v7 }
 0x254   :  { %v1832_v6 = vmul.f32 -1.442695, %v2844_v47 }
 0x255   :  { %v1833_v11 = vmul.f32 -1.442695, %v2845_v8 }
 0x256   :  { %2896 = vpow2.f32 %v1832_v6 }
 0x257   :  { %2898 = vpow2.f32 %v1833_v11 }
 0x260   :  { %v2897_v12 = vpop.eup %2896 }
 0x261   :  { %v761_v14 = vadd.f32 1.0, %v2897_v12  ;;  %v2899_v16 = vpop.eup %2898 }
 0x262   :  { %v768_v19 = vadd.f32 1.0, %v2899_v16 }
 0x263   :  { %2900 = vrcp.f32 %v761_v14 }
 0x264   :  { %2902 = vrcp.f32 %v768_v19 }
 0x26d   :  { %v2901_v22 = vpop.eup %2900 }
 0x26e   :  { %v772_v27 = vmul.f32 %v2901_v22, %v771_v21  ;;  %v2903_v32 = vpop.eup %2902 }
 0x26f   :  { %v775_v36 = vsub.f32 1.0, %v2903_v32  ;;  %v777_v39 = vmul.f32 %v2903_v32, %v3350_v62 }
 0x270   :  { %v773_v28 = vadd.f32 %v772_v27, %v3323_v44 }
 0x272   :  { %2904 = vtanh.f32 %v773_v28 }
 0x27c   :  { %v2905_v37 = vpop.eup %2904 }
 0x27d   :  { %v776_v38 = vmul.f32 %v2905_v37, %v775_v36 }
 0x27f   :  { %v3395_v43 = vadd.f32 %v777_v39, %v776_v38 }
 0x281   :  { %780 = vst [vmem:[#allocation10 + $0x8] sm:$0xff] %v3395_v43  ;;  %850 = vmatmul.mubr.f32.vlgmr.msra.gmra.mrb[4].mxu0 %v3395_v43  ;;  %2153 = vmatmul.mubr.f32.vlgmr.msra.gmra.mrb[12].mxu1 %v3395_v43 }
 0x282   :  { %2565 = vmatpush1.bf16.msra.mxu0 %v3187_v17  ;;  %2596 = vmatpush3.bf16.msra.mxu1 %v3208_v41 }
 0x283   :  { %2567 = vmatprep.subr.bf16.mxu0 %v3190_v18  ;;  %2597 = vmatprep.subr.bf16.mxu1 %v3092_v40 }
 0x284   :  { %1018 = vmatprep.mubr.f32.mxu0 %v3091_v0  ;;  %2187 = vmatprep.mubr.msk.f32.mxu1 %vm3093_vm0, %v3091_v0 }
 0x286   :  { %2569 = vmatpush1.bf16.msra.mxu0 %v3195_v25  ;;  %2599 = vmatpush3.bf16.msra.mxu1 %v3218_v51 }
 0x287   :  { %2571 = vmatprep.subr.bf16.mxu0 %v3198_v26  ;;  %2600 = vmatprep.subr.bf16.mxu1 %v3092_v40 }
 0x28a   :  { %2573 = vmatpush1.bf16.msra.mxu0 %v3202_v34  ;;  %2602 = vmatpush3.bf16.msra.mxu1 %v3229_v61 }
 0x28b   :  { %2575 = vmatprep.subr.bf16.mxu0 %v3205_v35  ;;  %2603 = vmatprep.subr.bf16.mxu1 %v3092_v40 }
 0x28e   :  { %2577 = vmatpush1.bf16.msra.mxu0 %v3212_v45  ;;  %2605 = vmatpush3.bf16.msra.mxu1 %v3240_v10 }
 0x28f   :  { %2579 = vmatprep.subr.bf16.mxu0 %v3215_v46  ;;  %2606 = vmatprep.subr.bf16.mxu1 %v3092_v40 }
 0x292   :  { %2581 = vmatpush1.bf16.msra.mxu0 %v3223_v55  ;;  %2608 = vmatpush3.bf16.msra.mxu1 %v3251_v20 }
 0x293   :  { %2583 = vmatprep.subr.bf16.mxu0 %v3226_v56  ;;  %2609 = vmatprep.subr.bf16.mxu1 %v3092_v40 }
 0x296   :  { %2585 = vmatpush1.bf16.msra.mxu0 %v3234_v2  ;;  %2611 = vmatpush3.bf16.msra.mxu1 %v3262_v24 }
 0x297   :  { %2587 = vmatprep.subr.bf16.mxu0 %v3237_v4  ;;  %2612 = vmatprep.subr.bf16.mxu1 %v3092_v40 }
 0x29a   :  { %2589 = vmatpush1.bf16.msra.mxu0 %v3245_v13  ;;  %2614 = vmatpush3.bf16.msra.mxu1 %v3274_v30 }
 0x29b   :  { %2591 = vmatprep.subr.bf16.mxu0 %v3248_v15  ;;  %2615 = vmatprep.subr.bf16.mxu1 %v3092_v40 }
 0x29e   :  { %2593 = vmatpush1.bf16.msra.mxu0 %v3258_v23  ;;  %2617 = vmatpush3.bf16.msra.mxu1 %v3282_v33 }
 0x29f   :  { %2619 = vmatprep.subr.bf16.mxu0 %v3185_v9  ;;  %2650 = vmatprep.subr.bf16.mxu1 %v3092_v40 }
 0x354   :  { %v851_v44 = vpop.f32.mrb[4].mxu0  ;;  %v922_v48 = vpop.f32.mrb[12].mxu1 }
 0x355   :  { %v2846_v50 = vadd.f32 %v851_v44, %v3337_v5  ;;  %v853_v53 = vpop.f32.mrb[5].mxu0  ;;  %v2154_v57 = vpop.f32.mrb[13].mxu1  ;;  %v940_v6 = vadd.f32 %v3346_v31, %v922_v48 }
 0x356   :  { %v2847_v62 = vadd.f32 %v853_v53, %v3339_v7 }
 0x357   :  { %v1834_v59 = vmul.f32 -1.442695, %v2846_v50 }
 0x358   :  { %v1835_v29 = vmul.f32 -1.442695, %v2847_v62 }
 0x359   :  { %2906 = vpow2.f32 %v1834_v59 }
 0x35a   :  { %2908 = vpow2.f32 %v1835_v29 }
 0x363   :  { %v2907_v42 = vpop.eup %2906 }
 0x364   :  { %v930_v47 = vadd.f32 1.0, %v2907_v42  ;;  %v2909_v1 = vpop.eup %2908 }
 0x365   :  { %v937_v3 = vadd.f32 1.0, %v2909_v1 }
 0x366   :  { %2910 = vrcp.f32 %v930_v47 }
 0x367   :  { %2912 = vrcp.f32 %v937_v3 }
 0x370   :  { %v2911_v8 = vpop.eup %2910 }
 0x371   :  { %v941_v11 = vmul.f32 %v2911_v8, %v940_v6  ;;  %v2913_v14 = vpop.eup %2912 }
 0x372   :  { %v944_v16 = vsub.f32 1.0, %v2913_v14  ;;  %v946_v22 = vmul.f32 %v2913_v14, %v3395_v43 }
 0x373   :  { %v942_v12 = vadd.f32 %v941_v11, %v3327_v52 }
 0x375   :  { %2914 = vtanh.f32 %v942_v12 }
 0x37f   :  { %v2915_v19 = vpop.eup %2914 }
 0x380   :  { %v945_v21 = vmul.f32 %v2915_v19, %v944_v16 }
 0x382   :  { %v3440_v27 = vadd.f32 %v946_v22, %v945_v21 }
 0x384   :  { %949 = vst [vmem:[#allocation10 + $0x10] sm:$0xff] %v3440_v27  ;;  %1019 = vmatmul.mubr.f32.vlgmr.msra.gmra.mrb[6].mxu0 %v3440_v27  ;;  %2188 = vmatmul.mubr.f32.vlgmr.msra.gmra.mrb[14].mxu1 %v3440_v27 }
 0x385   :  { %2621 = vmatpush1.bf16.msra.mxu0 %v3187_v17  ;;  %2652 = vmatpush3.bf16.msra.mxu1 %v3208_v41 }
 0x386   :  { %2623 = vmatprep.subr.bf16.mxu0 %v3190_v18  ;;  %2653 = vmatprep.subr.bf16.mxu1 %v3092_v40 }
 0x387   :  { %1187 = vmatprep.mubr.f32.mxu0 %v3091_v0  ;;  %2222 = vmatprep.mubr.msk.f32.mxu1 %vm3093_vm0, %v3091_v0 }
 0x389   :  { %2625 = vmatpush1.bf16.msra.mxu0 %v3195_v25  ;;  %2655 = vmatpush3.bf16.msra.mxu1 %v3218_v51 }
 0x38a   :  { %2627 = vmatprep.subr.bf16.mxu0 %v3198_v26  ;;  %2656 = vmatprep.subr.bf16.mxu1 %v3092_v40 }
 0x38d   :  { %2629 = vmatpush1.bf16.msra.mxu0 %v3202_v34  ;;  %2658 = vmatpush3.bf16.msra.mxu1 %v3229_v61 }
 0x38e   :  { %2631 = vmatprep.subr.bf16.mxu0 %v3205_v35  ;;  %2659 = vmatprep.subr.bf16.mxu1 %v3092_v40 }
 0x391   :  { %2633 = vmatpush1.bf16.msra.mxu0 %v3212_v45  ;;  %2661 = vmatpush3.bf16.msra.mxu1 %v3240_v10 }
 0x392   :  { %2635 = vmatprep.subr.bf16.mxu0 %v3215_v46  ;;  %2662 = vmatprep.subr.bf16.mxu1 %v3092_v40 }
 0x395   :  { %2637 = vmatpush1.bf16.msra.mxu0 %v3223_v55  ;;  %2664 = vmatpush3.bf16.msra.mxu1 %v3251_v20 }
 0x396   :  { %2639 = vmatprep.subr.bf16.mxu0 %v3226_v56  ;;  %2665 = vmatprep.subr.bf16.mxu1 %v3092_v40 }
 0x399   :  { %2641 = vmatpush1.bf16.msra.mxu0 %v3234_v2  ;;  %2667 = vmatpush3.bf16.msra.mxu1 %v3262_v24 }
 0x39a   :  { %2643 = vmatprep.subr.bf16.mxu0 %v3237_v4  ;;  %2668 = vmatprep.subr.bf16.mxu1 %v3092_v40 }
 0x39d   :  { %2645 = vmatpush1.bf16.msra.mxu0 %v3245_v13  ;;  %2670 = vmatpush3.bf16.msra.mxu1 %v3274_v30 }
 0x39e   :  { %2647 = vmatprep.subr.bf16.mxu0 %v3248_v15  ;;  %2671 = vmatprep.subr.bf16.mxu1 %v3092_v40 }
 0x3a1   :  { %2649 = vmatpush1.bf16.msra.mxu0 %v3258_v23  ;;  %2673 = vmatpush3.bf16.msra.mxu1 %v3282_v33 }
 0x3a2   :  { %2675 = vmatprep.subr.bf16.mxu0 %v3185_v9  ;;  %2706 = vmatprep.subr.bf16.mxu1 %v3092_v40 }
 0x457   :  { %v1020_v52 = vpop.f32.mrb[6].mxu0  ;;  %v1091_v28 = vpop.f32.mrb[14].mxu1 }
 0x458   :  { %v2848_v32 = vadd.f32 %v1020_v52, %v3337_v5  ;;  %v1022_v36 = vpop.f32.mrb[7].mxu0  ;;  %v2189_v37 = vpop.f32.mrb[15].mxu1  ;;  %v1109_v57 = vadd.f32 %v3346_v31, %v1091_v28 }
 0x459   :  { %v2849_v39 = vadd.f32 %v1022_v36, %v3339_v7 }
 0x45a   :  { %v1836_v38 = vmul.f32 -1.442695, %v2848_v32 }
 0x45b   :  { %v1837_v43 = vmul.f32 -1.442695, %v2849_v39 }
 0x45c   :  { %2916 = vpow2.f32 %v1836_v38 }
 0x45d   :  { %2918 = vpow2.f32 %v1837_v43 }
 0x466   :  { %v2917_v44 = vpop.eup %2916 }
 0x467   :  { %v1099_v48 = vadd.f32 1.0, %v2917_v44  ;;  %v2919_v50 = vpop.eup %2918 }
 0x468   :  { %v1106_v53 = vadd.f32 1.0, %v2919_v50 }
 0x469   :  { %2920 = vrcp.f32 %v1099_v48 }
 0x46a   :  { %2922 = vrcp.f32 %v1106_v53 }
 0x473   :  { %v2921_v59 = vpop.eup %2920 }
 0x474   :  { %v1110_v62 = vmul.f32 %v2921_v59, %v1109_v57  ;;  %v2923_v42 = vpop.eup %2922 }
 0x475   :  { %v1113_v47 = vsub.f32 1.0, %v2923_v42  ;;  %v1115_v6 = vmul.f32 %v2923_v42, %v3440_v27 }
 0x476   :  { %v1111_v29 = vadd.f32 %v1110_v62, %v3325_v49 }
 0x478   :  { %2924 = vtanh.f32 %v1111_v29 }
 0x482   :  { %v2925_v1 = vpop.eup %2924 }
 0x483   :  { %v1114_v3 = vmul.f32 %v2925_v1, %v1113_v47 }
 0x485   :  { %v3485_v8 = vadd.f32 %v1115_v6, %v1114_v3 }
 0x487   :  { %1118 = vst [vmem:[#allocation10 + $0x18] sm:$0xff] %v3485_v8  ;;  %1188 = vmatmul.mubr.f32.vlgmr.msra.gmra.mrb[8].mxu0 %v3485_v8  ;;  %2223 = vmatmul.mubr.f32.vlgmr.msra.gmra.mrb[16].mxu1 %v3485_v8 }
 0x488   :  { %2677 = vmatpush1.bf16.msra.mxu0 %v3187_v17  ;;  %2708 = vmatpush3.bf16.msra.mxu1 %v3208_v41 }
 0x489   :  { %2679 = vmatprep.subr.bf16.mxu0 %v3190_v18  ;;  %2709 = vmatprep.subr.bf16.mxu1 %v3092_v40 }
 0x48a   :  { %1356 = vmatprep.mubr.f32.mxu0 %v3091_v0  ;;  %2257 = vmatprep.mubr.msk.f32.mxu1 %vm3093_vm0, %v3091_v0 }
 0x48c   :  { %2681 = vmatpush1.bf16.msra.mxu0 %v3195_v25  ;;  %2711 = vmatpush3.bf16.msra.mxu1 %v3218_v51 }
 0x48d   :  { %2683 = vmatprep.subr.bf16.mxu0 %v3198_v26  ;;  %2712 = vmatprep.subr.bf16.mxu1 %v3092_v40 }
 0x490   :  { %2685 = vmatpush1.bf16.msra.mxu0 %v3202_v34  ;;  %2714 = vmatpush3.bf16.msra.mxu1 %v3229_v61 }
 0x491   :  { %2687 = vmatprep.subr.bf16.mxu0 %v3205_v35  ;;  %2715 = vmatprep.subr.bf16.mxu1 %v3092_v40 }
 0x494   :  { %2689 = vmatpush1.bf16.msra.mxu0 %v3212_v45  ;;  %2717 = vmatpush3.bf16.msra.mxu1 %v3240_v10 }
 0x495   :  { %2691 = vmatprep.subr.bf16.mxu0 %v3215_v46  ;;  %2718 = vmatprep.subr.bf16.mxu1 %v3092_v40 }
 0x498   :  { %2693 = vmatpush1.bf16.msra.mxu0 %v3223_v55  ;;  %2720 = vmatpush3.bf16.msra.mxu1 %v3251_v20 }
 0x499   :  { %2695 = vmatprep.subr.bf16.mxu0 %v3226_v56  ;;  %2721 = vmatprep.subr.bf16.mxu1 %v3092_v40 }
 0x49c   :  { %2697 = vmatpush1.bf16.msra.mxu0 %v3234_v2  ;;  %2723 = vmatpush3.bf16.msra.mxu1 %v3262_v24 }
 0x49d   :  { %2699 = vmatprep.subr.bf16.mxu0 %v3237_v4  ;;  %2724 = vmatprep.subr.bf16.mxu1 %v3092_v40 }
 0x4a0   :  { %2701 = vmatpush1.bf16.msra.mxu0 %v3245_v13  ;;  %2726 = vmatpush3.bf16.msra.mxu1 %v3274_v30 }
 0x4a1   :  { %2703 = vmatprep.subr.bf16.mxu0 %v3248_v15  ;;  %2727 = vmatprep.subr.bf16.mxu1 %v3092_v40 }
 0x4a4   :  { %2705 = vmatpush1.bf16.msra.mxu0 %v3258_v23  ;;  %2729 = vmatpush3.bf16.msra.mxu1 %v3282_v33 }
 0x4a5   :  { %2731 = vmatprep.subr.bf16.mxu0 %v3185_v9  ;;  %2762 = vmatprep.subr.bf16.mxu1 %v3092_v40 }
 0x55a   :  { %v1189_v49 = vpop.f32.mrb[8].mxu0  ;;  %v1260_v11 = vpop.f32.mrb[16].mxu1 }
 0x55b   :  { %v2850_v12 = vadd.f32 %v1189_v49, %v3337_v5  ;;  %v1191_v14 = vpop.f32.mrb[9].mxu0  ;;  %v2224_v16 = vpop.f32.mrb[17].mxu1  ;;  %v1278_v36 = vadd.f32 %v3346_v31, %v1260_v11 }
 0x55c   :  { %v2851_v21 = vadd.f32 %v1191_v14, %v3339_v7 }
 0x55d   :  { %v1838_v19 = vmul.f32 -1.442695, %v2850_v12 }
 0x55e   :  { %v1839_v22 = vmul.f32 -1.442695, %v2851_v21 }
 0x55f   :  { %2926 = vpow2.f32 %v1838_v19 }
 0x560   :  { %2928 = vpow2.f32 %v1839_v22 }
 0x569   :  { %v2927_v27 = vpop.eup %2926 }
 0x56a   :  { %v1268_v52 = vadd.f32 1.0, %v2927_v27  ;;  %v2929_v28 = vpop.eup %2928 }
 0x56b   :  { %v1275_v32 = vadd.f32 1.0, %v2929_v28 }
 0x56c   :  { %2930 = vrcp.f32 %v1268_v52 }
 0x56d   :  { %2932 = vrcp.f32 %v1275_v32 }
 0x576   :  { %v2931_v37 = vpop.eup %2930 }
 0x577   :  { %v1279_v38 = vmul.f32 %v2931_v37, %v1278_v36  ;;  %v2933_v43 = vpop.eup %2932 }
 0x578   :  { %v1282_v44 = vsub.f32 1.0, %v2933_v43  ;;  %v1284_v53 = vmul.f32 %v2933_v43, %v3485_v8 }
 0x579   :  { %v1280_v39 = vadd.f32 %v1279_v38, %v3331_v58 }
 0x57b   :  { %2934 = vtanh.f32 %v1280_v39 }
 0x585   :  { %v2935_v48 = vpop.eup %2934 }
 0x586   :  { %v1283_v50 = vmul.f32 %v2935_v48, %v1282_v44 }
 0x588   :  { %v3530_v57 = vadd.f32 %v1284_v53, %v1283_v50 }
 0x58a   :  { %1287 = vst [vmem:[#allocation10 + $0x20] sm:$0xff] %v3530_v57  ;;  %1357 = vmatmul.mubr.f32.vlgmr.msra.gmra.mrb[10].mxu0 %v3530_v57  ;;  %2258 = vmatmul.mubr.f32.vlgmr.msra.gmra.mrb[18].mxu1 %v3530_v57 }
 0x58b   :  { %2733 = vmatpush1.bf16.msra.mxu0 %v3187_v17  ;;  %2764 = vmatpush3.bf16.msra.mxu1 %v3208_v41 }
 0x58c   :  { %2735 = vmatprep.subr.bf16.mxu0 %v3190_v18  ;;  %2765 = vmatprep.subr.bf16.mxu1 %v3092_v40 }
 0x58d   :  { %1525 = vmatprep.mubr.f32.mxu0 %v3091_v0  ;;  %2292 = vmatprep.mubr.msk.f32.mxu1 %vm3093_vm0, %v3091_v0 }
 0x58f   :  { %2737 = vmatpush1.bf16.msra.mxu0 %v3195_v25  ;;  %2767 = vmatpush3.bf16.msra.mxu1 %v3218_v51 }
 0x590   :  { %2739 = vmatprep.subr.bf16.mxu0 %v3198_v26  ;;  %2768 = vmatprep.subr.bf16.mxu1 %v3092_v40 }
 0x593   :  { %2741 = vmatpush1.bf16.msra.mxu0 %v3202_v34  ;;  %2770 = vmatpush3.bf16.msra.mxu1 %v3229_v61 }
 0x594   :  { %2743 = vmatprep.subr.bf16.mxu0 %v3205_v35  ;;  %2771 = vmatprep.subr.bf16.mxu1 %v3092_v40 }
 0x597   :  { %2745 = vmatpush1.bf16.msra.mxu0 %v3212_v45  ;;  %2773 = vmatpush3.bf16.msra.mxu1 %v3240_v10 }
 0x598   :  { %2747 = vmatprep.subr.bf16.mxu0 %v3215_v46  ;;  %2774 = vmatprep.subr.bf16.mxu1 %v3092_v40 }
 0x59b   :  { %2749 = vmatpush1.bf16.msra.mxu0 %v3223_v55  ;;  %2776 = vmatpush3.bf16.msra.mxu1 %v3251_v20 }
 0x59c   :  { %2751 = vmatprep.subr.bf16.mxu0 %v3226_v56  ;;  %2777 = vmatprep.subr.bf16.mxu1 %v3092_v40 }
 0x59f   :  { %2753 = vmatpush1.bf16.msra.mxu0 %v3234_v2  ;;  %2779 = vmatpush3.bf16.msra.mxu1 %v3262_v24 }
 0x5a0   :  { %2755 = vmatprep.subr.bf16.mxu0 %v3237_v4  ;;  %2780 = vmatprep.subr.bf16.mxu1 %v3092_v40 }
 0x5a3   :  { %2757 = vmatpush1.bf16.msra.mxu0 %v3245_v13  ;;  %2782 = vmatpush3.bf16.msra.mxu1 %v3274_v30 }
 0x5a4   :  { %2759 = vmatprep.subr.bf16.mxu0 %v3248_v15  ;;  %2783 = vmatprep.subr.bf16.mxu1 %v3092_v40 }
 0x5a7   :  { %2761 = vmatpush1.bf16.msra.mxu0 %v3258_v23  ;;  %2785 = vmatpush3.bf16.msra.mxu1 %v3282_v33 }
 0x5a8   :  { %2787 = vmatprep.subr.bf16.mxu0 %v3185_v9  ;;  %2818 = vmatprep.subr.bf16.mxu1 %v3092_v40 }
 0x65d   :  { %v1358_v58 = vpop.f32.mrb[10].mxu0  ;;  %v1429_v59 = vpop.f32.mrb[18].mxu1 }
 0x65e   :  { %v2852_v62 = vadd.f32 %v1358_v58, %v3337_v5  ;;  %v1360_v29 = vpop.f32.mrb[11].mxu0  ;;  %v2259_v42 = vpop.f32.mrb[19].mxu1  ;;  %v1447_v9 = vadd.f32 %v3346_v31, %v1429_v59 }
 0x65f   :  { %v2853_v1 = vadd.f32 %v1360_v29, %v3339_v7 }
 0x660   :  { %v1840_v47 = vmul.f32 -1.442695, %v2852_v62 }
 0x661   :  { %v1841_v3 = vmul.f32 -1.442695, %v2853_v1 }
 0x662   :  { %2936 = vpow2.f32 %v1840_v47 }
 0x663   :  { %2938 = vpow2.f32 %v1841_v3 }
 0x66c   :  { %v2937_v6 = vpop.eup %2936 }
 0x66d   :  { %v1437_v8 = vadd.f32 1.0, %v2937_v6  ;;  %v2939_v49 = vpop.eup %2938 }
 0x66e   :  { %v1444_v11 = vadd.f32 1.0, %v2939_v49 }
 0x66f   :  { %2940 = vrcp.f32 %v1437_v8 }
 0x670   :  { %2942 = vrcp.f32 %v1444_v11 }
 0x679   :  { %v2941_v12 = vpop.eup %2940 }
 0x67a   :  { %v1448_v14 = vmul.f32 %v2941_v12, %v1447_v9  ;;  %v2943_v19 = vpop.eup %2942 }
 0x67b   :  { %v1451_v21 = vsub.f32 1.0, %v2943_v19  ;;  %v1453_v52 = vmul.f32 %v2943_v19, %v3530_v57 }
 0x67c   :  { %v1449_v16 = vadd.f32 %v1448_v14, %v3329_v54 }
 0x67e   :  { %2944 = vtanh.f32 %v1449_v16 }
 0x688   :  { %v2945_v22 = vpop.eup %2944 }
 0x689   :  { %v1452_v27 = vmul.f32 %v2945_v22, %v1451_v21 }
 0x68b   :  { %v1454_v28 = vadd.f32 %v1453_v52, %v1452_v27 }
 0x68d   :  { %1456 = vst [vmem:[#allocation10 + $0x28] sm:$0xff] %v1454_v28  ;;  %1526 = vmatmul.mubr.f32.vlgmr.msra.gmra.mrb[12].mxu0 %v1454_v28  ;;  %2293 = vmatmul.mubr.f32.vlgmr.msra.gmra.mrb[20].mxu1 %v1454_v28 }
 0x68e   :  { %2789 = vmatpush1.bf16.msra.mxu0 %v3187_v17  ;;  %2820 = vmatpush3.bf16.msra.mxu1 %v3208_v41 }
 0x68f   :  { %2791 = vmatprep.subr.bf16.mxu0 %v3190_v18  ;;  %2821 = vmatprep.subr.bf16.mxu1 %v3092_v40 }
 0x690   :  { %1694 = vmatprep.mubr.f32.mxu0 %v3091_v0  ;;  %2327 = vmatprep.mubr.msk.f32.mxu1 %vm3093_vm0, %v3091_v0 }
 0x692   :  { %2793 = vmatpush1.bf16.msra.mxu0 %v3195_v25  ;;  %2823 = vmatpush3.bf16.msra.mxu1 %v3218_v51 }
 0x693   :  { %2795 = vmatprep.subr.bf16.mxu0 %v3198_v26  ;;  %2824 = vmatprep.subr.bf16.mxu1 %v3092_v40 }
 0x696   :  { %2797 = vmatpush1.bf16.msra.mxu0 %v3202_v34  ;;  %2826 = vmatpush3.bf16.msra.mxu1 %v3229_v61 }
 0x697   :  { %2799 = vmatprep.subr.bf16.mxu0 %v3205_v35  ;;  %2827 = vmatprep.subr.bf16.mxu1 %v3092_v40 }
 0x69a   :  { %2801 = vmatpush1.bf16.msra.mxu0 %v3212_v45  ;;  %2829 = vmatpush3.bf16.msra.mxu1 %v3240_v10 }
 0x69b   :  { %2803 = vmatprep.subr.bf16.mxu0 %v3215_v46  ;;  %2830 = vmatprep.subr.bf16.mxu1 %v3092_v40 }
 0x69e   :  { %2805 = vmatpush1.bf16.msra.mxu0 %v3223_v55  ;;  %2832 = vmatpush3.bf16.msra.mxu1 %v3251_v20 }
 0x69f   :  { %2807 = vmatprep.subr.bf16.mxu0 %v3226_v56  ;;  %2833 = vmatprep.subr.bf16.mxu1 %v3092_v40 }
 0x6a2   :  { %2809 = vmatpush1.bf16.msra.mxu0 %v3234_v2  ;;  %2835 = vmatpush3.bf16.msra.mxu1 %v3262_v24 }
 0x6a3   :  { %2811 = vmatprep.subr.bf16.mxu0 %v3237_v4  ;;  %2836 = vmatprep.subr.bf16.mxu1 %v3092_v40 }
 0x6a6   :  { %2813 = vmatpush1.bf16.msra.mxu0 %v3245_v13  ;;  %2838 = vmatpush3.bf16.msra.mxu1 %v3274_v30 }
 0x6a7   :  { %2815 = vmatprep.subr.bf16.mxu0 %v3248_v15  ;;  %2839 = vmatprep.subr.bf16.mxu1 %v3092_v40 }
 0x6aa   :  { %2817 = vmatpush1.bf16.msra.mxu0 %v3258_v23  ;;  %2841 = vmatpush3.bf16.msra.mxu1 %v3282_v33 }
 0x760   :  { %v1527_v0 = vpop.f32.mrb[12].mxu0  ;;  %v1598_v17 = vpop.f32.mrb[20].mxu1 }
 0x761   :  { %v2854_v18 = vadd.f32 %v1527_v0, %v3337_v5  ;;  %v1529_v25 = vpop.f32.mrb[13].mxu0  ;;  %v2294_v26 = vpop.f32.mrb[21].mxu1  ;;  %v1616_v55 = vadd.f32 %v3346_v31, %v1598_v17 }
 0x762   :  { %v2855_v35 = vadd.f32 %v1529_v25, %v3339_v7 }
 0x763   :  { %v1842_v34 = vmul.f32 -1.442695, %v2854_v18 }
 0x764   :  { %v1843_v41 = vmul.f32 -1.442695, %v2855_v35 }
 0x765   :  { %2946 = vpow2.f32 %v1842_v34 }
 0x766   :  { %2948 = vpow2.f32 %v1843_v41 }
 0x76f   :  { %v2947_v45 = vpop.eup %2946 }
 0x770   :  { %v1606_v46 = vadd.f32 1.0, %v2947_v45  ;;  %v2949_v40 = vpop.eup %2948 }
 0x771   :  { %v1613_v51 = vadd.f32 1.0, %v2949_v40 }
 0x772   :  { %2950 = vrcp.f32 %v1606_v46 }
 0x773   :  { %2952 = vrcp.f32 %v1613_v51 }
 0x77c   :  { %v2951_v56 = vpop.eup %2950 }
 0x77d   :  { %v1617_v61 = vmul.f32 %v2951_v56, %v1616_v55  ;;  %v2953_v4 = vpop.eup %2952 }
 0x77e   :  { %v1620_v10 = vsub.f32 1.0, %v2953_v4  ;;  %v1622_v20 = vmul.f32 %v2953_v4, %v1454_v28 }
 0x77f   :  { %v1618_v2 = vadd.f32 %v1617_v61, %v3335_v63 }
 0x781   :  { %2954 = vtanh.f32 %v1618_v2 }
 0x78b   :  { %v2955_v13 = vpop.eup %2954 }
 0x78c   :  { %v1621_v15 = vmul.f32 %v2955_v13, %v1620_v10 }
 0x78e   :  { %v1623_v23 = vadd.f32 %v1622_v20, %v1621_v15 }
 0x790   :  { %1625 = vst [vmem:[#allocation10 + $0x30] sm:$0xff] %v1623_v23  ;;  %1695 = vmatmul.mubr.f32.vlgmr.msra.gmra.mrb[14].mxu0 %v1623_v23  ;;  %2328 = vmatmul.mubr.f32.vlgmr.msra.gmra.mrb[22].mxu1 %v1623_v23 }
 0x863   :  { %v1696_v24 = vpop.f32.mrb[14].mxu0  ;;  %v1767_v30 = vpop.f32.mrb[22].mxu1 }
 0x864   :  { %v2856_v33 = vadd.f32 %v1696_v24, %v3337_v5  ;;  %v1698_v54 = vpop.f32.mrb[15].mxu0  ;;  %v2329_v32 = vpop.f32.mrb[23].mxu1  ;;  %v1785_v48 = vadd.f32 %v3346_v31, %v1767_v30 }
 0x865   :  { %v2857_v37 = vadd.f32 %v1698_v54, %v3339_v7 }
 0x866   :  { %v1844_v36 = vmul.f32 -1.442695, %v2856_v33 }
 0x867   :  { %v1845_v63 = vmul.f32 -1.442695, %v2857_v37 }
 0x868   :  { %2956 = vpow2.f32 %v1844_v36 }
 0x869   :  { %2958 = vpow2.f32 %v1845_v63 }
 0x872   :  { %v2957_v38 = vpop.eup %2956 }
 0x873   :  { %v1775_v39 = vadd.f32 1.0, %v2957_v38  ;;  %v2959_v43 = vpop.eup %2958 }
 0x874   :  { %v1782_v44 = vadd.f32 1.0, %v2959_v43 }
 0x875   :  { %2960 = vrcp.f32 %v1775_v39 }
 0x876   :  { %2962 = vrcp.f32 %v1782_v44 }
 0x87f   :  { %v2961_v50 = vpop.eup %2960 }
 0x880   :  { %v1786_v53 = vmul.f32 %v2961_v50, %v1785_v48  ;;  %v2963_v57 = vpop.eup %2962 }
 0x881   :  { %v1789_v58 = vsub.f32 1.0, %v2963_v57  ;;  %v1791_v62 = vmul.f32 %v2963_v57, %v1623_v23 }
 0x882   :  { %v1787_v5 = vadd.f32 %v1786_v53, %v3333_v60 }
 0x884   :  { %2964 = vtanh.f32 %v1787_v5 }
 0x88e   :  { %v2965_v59 = vpop.eup %2964 }
 0x88f   :  { %v1790_v7 = vmul.f32 %v2965_v59, %v1789_v58 }
 0x891   :  { %v1792_v29 = vadd.f32 %v1791_v62, %v1790_v7 }
 0x893   :  { %1794 = vst [vmem:[#allocation10 + $0x38] sm:$0xff] %v1792_v29  ;;  %1796 = vst [vmem:[#allocation11] sm:$0xff] %v1792_v29 }
 0x894   :  { %3043 = shalt.err (!%p3040_p0)
}
 0x895   :  { %s3044_s26 = scalar_lea.hbm %s3649_s6, 1024 }
 0x896   :  { %p3045_p1 = scmp.ne.s32.totalorder %s3649_s6, %s3044_s26  ;;  %p3048_p2 = scmp.lt.u32.totalorder %s3044_s26, %s3649_s6 }
 0x898   :  { %p3050_p3 = pnand %p3048_p2, %p3045_p1 }
 0x89a   :  { %3053 = shalt.err (!%p3050_p3)
}
 0x89b   :  { %1808 = dma.vmem_to_hbm [thread:$0]  %s1803_s19, 1024, %s3649_s6, [#allocation6], %s3088_s1, %s3088_s1, %s3089_s25  }
 0x89c   :  { %s3054_s10 = scalar_lea.vmem %s1816_s21, 128  ;;  %p3059_p5 = scmp.lt.s32.totalorder %s1816_s21, %s1816_s21 }
 0x89d   :  { %p3055_p4 = scmp.ne.s32.totalorder %s1816_s21, %s3054_s10  ;;  %p3060_p6 = scmp.lt.s32.totalorder %s3054_s10, %s3054_s10 }
 0x89f   :  { %p3061_p7 = por %p3060_p6, %p3059_p5 }
 0x8a1   :  { %p3062_p8 = pnand %p3061_p7, %p3055_p4 }
 0x8a3   :  { %3065 = shalt.err (!%p3062_p8)
}
 0x8a4   :  { %s3066_s15 = scalar_lea.hbm %s3650_s7, 128 }
 0x8a5   :  { %p3067_p9 = scmp.ne.s32.totalorder %s3650_s7, %s3066_s15  ;;  %p3070_p10 = scmp.lt.u32.totalorder %s3066_s15, %s3650_s7 }
 0x8a7   :  { %p3072_p11 = pnand %p3070_p10, %p3067_p9 }
 0x8a9   :  { %3075 = shalt.err (!%p3072_p11)
}
 0x8aa   :  { %1818 = dma.vmem_to_hbm [thread:$0]  %s1816_s21, 128, %s3650_s7, [#allocation12]  }
 0x8ab   :  { %3080 = dma.done.wait [#allocation6], 1024  }
 0x8ac   :  { %3081 = vsyncadd [#allocation6], 4294966272 }
 0x8ad   :  { %3082 = dma.done.wait [#allocation12], 128  }
 0x8ae   :  { %3083 = vsyncadd [#allocation12], 4294967168 }
 0x8af   :  { %1825 = vsyncpa [#allocation5], 1 }
 0x8b0   :  { %1826 = vsyncpa [#allocation8], 1 }
 0x8b1   :  { %1827 = vsyncpa [#allocation6], 1 }
 0x8b2   :  { %1828 = vsyncpa [#allocation12], 1 }

</bundles_post_ra>
